<compile_context>
chip_gen: v5e
topology: v5e:2x2
jax: 0.10.0
libtpu: 0.0.40
codegen_flags: <defaults>
</compile_context>

<pallas_src>
import jax
import jax.numpy as jnp
import numpy as np
from jax.experimental import pallas as pl
from jax.experimental.pallas import tpu as pltpu


# ----------------------------- Pallas kernel --------------------------------
def bigru_kernel(len_ref, x_ref, wih_all_ref, bias_all_ref,
                 whh_f_ref, whh_b_ref, bhn_f_ref, bhn_b_ref,
                 out_ref, hN_ref):
    """Fused bidirectional GRU over the full sequence (single grid step).

    len_ref      : (B, 1)     int32 sequence lengths
    x_ref        : (S*B, H)   embedded inputs, time-major (row t*B+b = (t, b))
    wih_all_ref  : (H, 6H)    [Wih_fwd | Wih_bwd], gate order [r, z, n]
    bias_all_ref : (1, 6H)    folded biases: b_ih + [b_hr, b_hz, 0] per dir
    whh_*_ref    : (H, 3H)    hidden weights per direction
    bhn_*_ref    : (1, H)     n-gate hidden bias per direction
    out_ref      : (S, B, H)  fwd + bwd per-step outputs (zero at padding)
    hN_ref       : (2, B, H)  final hidden states [fwd, bwd]
    """
    S, B, H = out_ref.shape
    H3 = 3 * H

    lengths = len_ref[...]                                   # (B, 1) int32

    # --- hoisted input projection: all timesteps, both directions, one dot ---
    gi_all = jnp.dot(x_ref[...], wih_all_ref[...],
                     preferred_element_type=jnp.float32) + bias_all_ref[...]
    # gi_all: (S*B, 6H); columns [0:3H) = fwd gates, [3H:6H) = bwd gates.

    whh_f = whh_f_ref[...]
    whh_b = whh_b_ref[...]
    bhn_f = bhn_f_ref[...]
    bhn_b = bhn_b_ref[...]

    def gru_step(gi, gh, bhn, h):
        # TODO(synk): at real sizes make H a multiple of 128 so these gate
        # slices are lane-tile aligned (no cross-lane work on the chain).
        r = jax.nn.sigmoid(gi[:, 0:H] + gh[:, 0:H])
        z = jax.nn.sigmoid(gi[:, H:2 * H] + gh[:, H:2 * H])
        n = jnp.tanh(gi[:, 2 * H:] + r * (gh[:, 2 * H:] + bhn))
        return (1.0 - z) * n + z * h

    h_f = jnp.zeros((B, H), jnp.float32)
    h_b = jnp.zeros((B, H), jnp.float32)
    fwd_out = [None] * S
    bwd_out = [None] * S

    # Interleaved fwd/bwd recurrence: two independent dependency chains per
    # iteration.  S is small and static, so the Python loop is a full unroll
    # with concrete time indices (static slices, no per-step grid overhead).
    # TODO(synk): for large S switch to lax.fori_loop(..., unroll=4..8) plus an
    # S-chunk grid axis so live ranges / VMEM stay bounded.
    for i in range(S):
        tf = i
        tb = S - 1 - i

        gh_f = jnp.dot(h_f, whh_f, preferred_element_type=jnp.float32)
        gh_b = jnp.dot(h_b, whh_b, preferred_element_type=jnp.float32)

        gi_f = gi_all[tf * B:(tf + 1) * B, 0:H3]
        gi_b = gi_all[tb * B:(tb + 1) * B, H3:2 * H3]

        hf_new = gru_step(gi_f, gh_f, bhn_f, h_f)
        hb_new = gru_step(gi_b, gh_b, bhn_b, h_b)

        mf = tf < lengths                                    # (B, 1) bool
        mb = tb < lengths

        fwd_out[tf] = jnp.where(mf, hf_new, 0.0)
        bwd_out[tb] = jnp.where(mb, hb_new, 0.0)

        # packed-sequence semantics: padded steps do not advance the state.
        h_f = jnp.where(mf, hf_new, h_f)
        h_b = jnp.where(mb, hb_new, h_b)

    # Single writeback: fwd + bwd summed and stored once (no per-step masked
    # stores, no read-modify-write of out_ref).
    out = jnp.stack([fwd_out[t] + bwd_out[t] for t in range(S)], axis=0)
    out_ref[...] = out.astype(out_ref.dtype)
    hN_ref[0] = h_f.astype(hN_ref.dtype)
    hN_ref[1] = h_b.astype(hN_ref.dtype)


def bidir_gru(x_flat, lengths, wih_all, bias_all, whh_f, whh_b, bhn_f, bhn_b,
              S, B, H):
    """One pallas_call: whole (small) problem resident in VMEM, grid=(1,)."""

    def full_spec(shape):
        nd = len(shape)
        return pl.BlockSpec(shape, lambda i, nd=nd: (0,) * nd)

    ins = (lengths, x_flat, wih_all, bias_all, whh_f, whh_b, bhn_f, bhn_b)
    in_specs = [full_spec(a.shape) for a in ins]

    out_shape = (jax.ShapeDtypeStruct((S, B, H), x_flat.dtype),
                 jax.ShapeDtypeStruct((2, B, H), x_flat.dtype))
    out_specs = (full_spec((S, B, H)), full_spec((2, B, H)))

    return pl.pallas_call(
        bigru_kernel,
        out_shape=out_shape,
        grid_spec=pltpu.PrefetchScalarGridSpec(
            num_scalar_prefetch=0,
            grid=(1,),
            in_specs=in_specs,
            out_specs=out_specs,
        ),
        compiler_params=pltpu.CompilerParams(
            dimension_semantics=("arbitrary",)),
    )(*ins)


# ------------------------------ Encoder module -------------------------------
def init_params(key, vocab_size, hidden_size):
    """Deterministic synthetic parameters (mirrors nn.Embedding + nn.GRU shapes)
    with fused-gate weight layout (Hin, 3H) / (H, 3H), gate order [r, z, n]."""
    H = hidden_size
    ks = jax.random.split(key, 9)
    scale = 1.0 / np.sqrt(H)
    emb = jax.random.normal(ks[0], (vocab_size, H), jnp.float32)

    def gru_dir(k0, k1, k2, k3):
        w_ih = jax.random.uniform(k0, (H, 3 * H), jnp.float32, -scale, scale)
        w_hh = jax.random.uniform(k1, (H, 3 * H), jnp.float32, -scale, scale)
        b_ih = jax.random.uniform(k2, (1, 3 * H), jnp.float32, -scale, scale)
        b_hh = jax.random.uniform(k3, (1, 3 * H), jnp.float32, -scale, scale)
        return w_ih, w_hh, b_ih, b_hh

    fwd = gru_dir(ks[1], ks[2], ks[3], ks[4])
    bwd = gru_dir(ks[5], ks[6], ks[7], ks[8])
    return emb, fwd, bwd


@jax.jit
def encoder_forward(params, input_seqs, input_lengths):
    """EncoderRNN.forward:
       input_seqs (S, B) int32, input_lengths (B,) int32
       -> outputs (S, B, H), hidden (2, B, H)"""
    emb, fwd, bwd = params
    S, B = input_seqs.shape
    H = emb.shape[1]

    # Embedding lookup (glue), already time-major-flat for the fused projection.
    # TODO(synk): fuse the gather into the kernel via scalar-prefetched ids.
    x = jnp.take(emb, input_seqs.reshape(-1), axis=0)          # (S*B, H)
    lengths = input_lengths.astype(jnp.int32).reshape(B, 1)    # (B, 1)

    (wih_f, whh_f, bih_f, bhh_f) = fwd
    (wih_b, whh_b, bih_b, bhh_b) = bwd

    def fold_bias(b_ih, b_hh):
        # r,z hidden biases fold into the precomputed input projection; the
        # n-gate hidden bias must stay inside r*(...) and is passed separately.
        return jnp.concatenate([b_ih[:, :2 * H] + b_hh[:, :2 * H],
                                b_ih[:, 2 * H:]], axis=1)

    wih_all = jnp.concatenate([wih_f, wih_b], axis=1)                  # (H, 6H)
    bias_all = jnp.concatenate([fold_bias(bih_f, bhh_f),
                                fold_bias(bih_b, bhh_b)], axis=1)      # (1, 6H)
    bhn_f = bhh_f[:, 2 * H:]                                           # (1, H)
    bhn_b = bhh_b[:, 2 * H:]

    return bidir_gru(x, lengths, wih_all, bias_all, whh_f, whh_b,
                     bhn_f, bhn_b, S, B, H)


# ------------------------------ pure-JAX reference ----------------------------
def _ref_direction(x, mask, w_ih, w_hh, b_ih, b_hh, reverse):
    S, B, _ = x.shape
    H = w_hh.shape[0]
    ts = range(S - 1, -1, -1) if reverse else range(S)
    h = jnp.zeros((B, H), jnp.float32)
    outs = [None] * S
    for t in ts:
        xt, m = x[t], mask[t]
        gi = xt @ w_ih + b_ih
        gh = h @ w_hh + b_hh
        r = jax.nn.sigmoid(gi[:, :H] + gh[:, :H])
        z = jax.nn.sigmoid(gi[:, H:2 * H] + gh[:, H:2 * H])
        n = jnp.tanh(gi[:, 2 * H:] + r * gh[:, 2 * H:])
        h_new = (1 - z) * n + z * h
        h = m * h_new + (1 - m) * h
        outs[t] = m * h_new
    return jnp.stack(outs, 0), h


def encoder_forward_ref(params, input_seqs, input_lengths):
    emb, fwd, bwd = params
    S, B = input_seqs.shape
    x = jnp.take(emb, input_seqs, axis=0)
    mask = (jnp.arange(S)[:, None] < input_lengths[None, :]).astype(jnp.float32)[:, :, None]
    of, hf = _ref_direction(x, mask, *fwd, reverse=False)
    ob, hb = _ref_direction(x, mask, *bwd, reverse=True)
    return of + ob, jnp.stack([hf, hb], 0)


# ---------------------------------- main --------------------------------------
if __name__ == "__main__":
    S, B, H, VOCAB = 8, 4, 32, 50

    key = jax.random.PRNGKey(0)
    k_par, k_seq = jax.random.split(key)
    params = init_params(k_par, VOCAB, H)

    input_seqs = jax.random.randint(k_seq, (S, B), 0, VOCAB, dtype=jnp.int32)
    # pack_padded_sequence expects sorted-descending lengths
    input_lengths = jnp.array([8, 7, 5, 3], dtype=jnp.int32)

    outputs, hidden = encoder_forward(params, input_seqs, input_lengths)
    jax.block_until_ready((outputs, hidden))

    ref_out, ref_hid = encoder_forward_ref(params, input_seqs, input_lengths)
    np.testing.assert_allclose(np.asarray(outputs), np.asarray(ref_out),
                               rtol=1e-3, atol=1e-3)
    np.testing.assert_allclose(np.asarray(hidden), np.asarray(ref_hid),
                               rtol=1e-3, atol=1e-3)

    assert outputs.shape == (S, B, H)
    assert hidden.shape == (2, B, H)
    print("KERNEL_OK")
</pallas_src>

<mosaic_0001>
module attributes {stable_mosaic.version = 11 : i64} {
  func.func @bigru_kernel(%arg0: i32, %arg1: memref<4x1xi32, #tpu.memory_space<vmem>>, %arg2: memref<32x32xf32, #tpu.memory_space<vmem>>, %arg3: memref<32x192xf32, #tpu.memory_space<vmem>>, %arg4: memref<1x192xf32, #tpu.memory_space<vmem>>, %arg5: memref<32x96xf32, #tpu.memory_space<vmem>>, %arg6: memref<32x96xf32, #tpu.memory_space<vmem>>, %arg7: memref<1x32xf32, #tpu.memory_space<vmem>>, %arg8: memref<1x32xf32, #tpu.memory_space<vmem>>, %arg9: memref<8x4x32xf32, #tpu.memory_space<vmem>>, %arg10: memref<2x4x32xf32, #tpu.memory_space<vmem>>) attributes {dimension_semantics = [#tpu.dimension_semantics<arbitrary>], iteration_bounds = array<i64: 1>, scalar_prefetch = 0 : i64, scratch_operands = 0 : i64, tpu.core_type = #tpu.core_type<tc>, window_params = [{pipeline_mode = #tpu.pipeline_mode<synchronous>, transform_indices = @transform_0, window_bounds = array<i64: 4, 1>}, {pipeline_mode = #tpu.pipeline_mode<synchronous>, transform_indices = @transform_1, window_bounds = array<i64: 32, 32>}, {pipeline_mode = #tpu.pipeline_mode<synchronous>, transform_indices = @transform_2, window_bounds = array<i64: 32, 192>}, {pipeline_mode = #tpu.pipeline_mode<synchronous>, transform_indices = @transform_3, window_bounds = array<i64: 1, 192>}, {pipeline_mode = #tpu.pipeline_mode<synchronous>, transform_indices = @transform_4, window_bounds = array<i64: 32, 96>}, {pipeline_mode = #tpu.pipeline_mode<synchronous>, transform_indices = @transform_5, window_bounds = array<i64: 32, 96>}, {pipeline_mode = #tpu.pipeline_mode<synchronous>, transform_indices = @transform_6, window_bounds = array<i64: 1, 32>}, {pipeline_mode = #tpu.pipeline_mode<synchronous>, transform_indices = @transform_7, window_bounds = array<i64: 1, 32>}, {pipeline_mode = #tpu.pipeline_mode<synchronous>, transform_indices = @transform_8, window_bounds = array<i64: 8, 4, 32>}, {pipeline_mode = #tpu.pipeline_mode<synchronous>, transform_indices = @transform_9, window_bounds = array<i64: 2, 4, 32>}]} {
    %c0 = arith.constant 0 : index
    %c0_0 = arith.constant 0 : index
    %0 = vector.load %arg1[%c0, %c0_0] : memref<4x1xi32, #tpu.memory_space<vmem>>, vector<4x1xi32>
    %c0_1 = arith.constant 0 : index
    %c0_2 = arith.constant 0 : index
    %1 = vector.load %arg2[%c0_1, %c0_2] : memref<32x32xf32, #tpu.memory_space<vmem>>, vector<32x32xf32>
    %c0_3 = arith.constant 0 : index
    %c0_4 = arith.constant 0 : index
    %2 = vector.load %arg3[%c0_3, %c0_4] : memref<32x192xf32, #tpu.memory_space<vmem>>, vector<32x192xf32>
    %cst = arith.constant dense<0.000000e+00> : vector<32x192xf32>
    %3 = tpu.matmul %1, %2, %cst {dimension_numbers = #tpu.dot_dimension_numbers<[1], [0], [0], [1], [0, 0, 1, 1], [], []>} : vector<32x32xf32>, vector<32x192xf32>, vector<32x192xf32> -> vector<32x192xf32>
    %c0_5 = arith.constant 0 : index
    %c0_6 = arith.constant 0 : index
    %4 = vector.load %arg4[%c0_5, %c0_6] : memref<1x192xf32, #tpu.memory_space<vmem>>, vector<1x192xf32>
    %5 = vector.broadcast %4 : vector<1x192xf32> to vector<32x192xf32>
    %6 = arith.addf %3, %5 : vector<32x192xf32>
    %c0_7 = arith.constant 0 : index
    %c0_8 = arith.constant 0 : index
    %7 = vector.load %arg5[%c0_7, %c0_8] : memref<32x96xf32, #tpu.memory_space<vmem>>, vector<32x96xf32>
    %c0_9 = arith.constant 0 : index
    %c0_10 = arith.constant 0 : index
    %8 = vector.load %arg6[%c0_9, %c0_10] : memref<32x96xf32, #tpu.memory_space<vmem>>, vector<32x96xf32>
    %c0_11 = arith.constant 0 : index
    %c0_12 = arith.constant 0 : index
    %9 = vector.load %arg7[%c0_11, %c0_12] : memref<1x32xf32, #tpu.memory_space<vmem>>, vector<1x32xf32>
    %c0_13 = arith.constant 0 : index
    %c0_14 = arith.constant 0 : index
    %10 = vector.load %arg8[%c0_13, %c0_14] : memref<1x32xf32, #tpu.memory_space<vmem>>, vector<1x32xf32>
    %cst_15 = arith.constant 0.000000e+00 : f32
    %11 = vector.broadcast %cst_15 : f32 to vector<4x32xf32>
    %cst_16 = arith.constant 0.000000e+00 : f32
    %12 = vector.broadcast %cst_16 : f32 to vector<4x32xf32>
    %cst_17 = arith.constant dense<0.000000e+00> : vector<4x96xf32>
    %13 = tpu.matmul %11, %7, %cst_17 {dimension_numbers = #tpu.dot_dimension_numbers<[1], [0], [0], [1], [0, 0, 1, 1], [], []>} : vector<4x32xf32>, vector<32x96xf32>, vector<4x96xf32> -> vector<4x96xf32>
    %cst_18 = arith.constant dense<0.000000e+00> : vector<4x96xf32>
    %14 = tpu.matmul %12, %8, %cst_18 {dimension_numbers = #tpu.dot_dimension_numbers<[1], [0], [0], [1], [0, 0, 1, 1], [], []>} : vector<4x32xf32>, vector<32x96xf32>, vector<4x96xf32> -> vector<4x96xf32>
    %15 = vector.extract_strided_slice %6 {offsets = [0, 0], sizes = [4, 96], strides = [1, 1]} : vector<32x192xf32> to vector<4x96xf32>
    %16 = vector.extract_strided_slice %6 {offsets = [28, 96], sizes = [4, 96], strides = [1, 1]} : vector<32x192xf32> to vector<4x96xf32>
    %17 = vector.extract_strided_slice %15 {offsets = [0, 0], sizes = [4, 32], strides = [1, 1]} : vector<4x96xf32> to vector<4x32xf32>
    %18 = vector.extract_strided_slice %13 {offsets = [0, 0], sizes = [4, 32], strides = [1, 1]} : vector<4x96xf32> to vector<4x32xf32>
    %19 = arith.addf %17, %18 : vector<4x32xf32>
    %20 = arith.negf %19 : vector<4x32xf32>
    %21 = math.exp %20 : vector<4x32xf32>
    %cst_19 = arith.constant 1.000000e+00 : f32
    %22 = vector.broadcast %cst_19 : f32 to vector<4x32xf32>
    %23 = arith.addf %22, %21 : vector<4x32xf32>
    %24 = arith.divf %22, %23 : vector<4x32xf32>
    %25 = vector.extract_strided_slice %15 {offsets = [0, 32], sizes = [4, 32], strides = [1, 1]} : vector<4x96xf32> to vector<4x32xf32>
    %26 = vector.extract_strided_slice %13 {offsets = [0, 32], sizes = [4, 32], strides = [1, 1]} : vector<4x96xf32> to vector<4x32xf32>
    %27 = arith.addf %25, %26 : vector<4x32xf32>
    %28 = arith.negf %27 : vector<4x32xf32>
    %29 = math.exp %28 : vector<4x32xf32>
    %cst_20 = arith.constant 1.000000e+00 : f32
    %30 = vector.broadcast %cst_20 : f32 to vector<4x32xf32>
    %31 = arith.addf %30, %29 : vector<4x32xf32>
    %32 = arith.divf %30, %31 : vector<4x32xf32>
    %33 = vector.extract_strided_slice %15 {offsets = [0, 64], sizes = [4, 32], strides = [1, 1]} : vector<4x96xf32> to vector<4x32xf32>
    %34 = vector.extract_strided_slice %13 {offsets = [0, 64], sizes = [4, 32], strides = [1, 1]} : vector<4x96xf32> to vector<4x32xf32>
    %35 = vector.broadcast %9 : vector<1x32xf32> to vector<4x32xf32>
    %36 = arith.addf %34, %35 : vector<4x32xf32>
    %37 = arith.mulf %24, %36 : vector<4x32xf32>
    %38 = arith.addf %33, %37 : vector<4x32xf32>
    %39 = math.tanh %38 : vector<4x32xf32>
    %cst_21 = arith.constant 1.000000e+00 : f32
    %40 = vector.broadcast %cst_21 : f32 to vector<4x32xf32>
    %41 = arith.subf %40, %32 : vector<4x32xf32>
    %42 = arith.mulf %41, %39 : vector<4x32xf32>
    %43 = arith.mulf %32, %11 : vector<4x32xf32>
    %44 = arith.addf %42, %43 : vector<4x32xf32>
    %45 = vector.extract_strided_slice %16 {offsets = [0, 0], sizes = [4, 32], strides = [1, 1]} : vector<4x96xf32> to vector<4x32xf32>
    %46 = vector.extract_strided_slice %14 {offsets = [0, 0], sizes = [4, 32], strides = [1, 1]} : vector<4x96xf32> to vector<4x32xf32>
    %47 = arith.addf %45, %46 : vector<4x32xf32>
    %48 = arith.negf %47 : vector<4x32xf32>
    %49 = math.exp %48 : vector<4x32xf32>
    %cst_22 = arith.constant 1.000000e+00 : f32
    %50 = vector.broadcast %cst_22 : f32 to vector<4x32xf32>
    %51 = arith.addf %50, %49 : vector<4x32xf32>
    %52 = arith.divf %50, %51 : vector<4x32xf32>
    %53 = vector.extract_strided_slice %16 {offsets = [0, 32], sizes = [4, 32], strides = [1, 1]} : vector<4x96xf32> to vector<4x32xf32>
    %54 = vector.extract_strided_slice %14 {offsets = [0, 32], sizes = [4, 32], strides = [1, 1]} : vector<4x96xf32> to vector<4x32xf32>
    %55 = arith.addf %53, %54 : vector<4x32xf32>
    %56 = arith.negf %55 : vector<4x32xf32>
    %57 = math.exp %56 : vector<4x32xf32>
    %cst_23 = arith.constant 1.000000e+00 : f32
    %58 = vector.broadcast %cst_23 : f32 to vector<4x32xf32>
    %59 = arith.addf %58, %57 : vector<4x32xf32>
    %60 = arith.divf %58, %59 : vector<4x32xf32>
    %61 = vector.extract_strided_slice %16 {offsets = [0, 64], sizes = [4, 32], strides = [1, 1]} : vector<4x96xf32> to vector<4x32xf32>
    %62 = vector.extract_strided_slice %14 {offsets = [0, 64], sizes = [4, 32], strides = [1, 1]} : vector<4x96xf32> to vector<4x32xf32>
    %63 = vector.broadcast %10 : vector<1x32xf32> to vector<4x32xf32>
    %64 = arith.addf %62, %63 : vector<4x32xf32>
    %65 = arith.mulf %52, %64 : vector<4x32xf32>
    %66 = arith.addf %61, %65 : vector<4x32xf32>
    %67 = math.tanh %66 : vector<4x32xf32>
    %cst_24 = arith.constant 1.000000e+00 : f32
    %68 = vector.broadcast %cst_24 : f32 to vector<4x32xf32>
    %69 = arith.subf %68, %60 : vector<4x32xf32>
    %70 = arith.mulf %69, %67 : vector<4x32xf32>
    %71 = arith.mulf %60, %12 : vector<4x32xf32>
    %72 = arith.addf %70, %71 : vector<4x32xf32>
    %c0_i32 = arith.constant 0 : i32
    %73 = vector.broadcast %c0_i32 : i32 to vector<4x1xi32>
    %74 = arith.cmpi sgt, %0, %73 : vector<4x1xi32>
    %c7_i32 = arith.constant 7 : i32
    %75 = vector.broadcast %c7_i32 : i32 to vector<4x1xi32>
    %76 = arith.cmpi sgt, %0, %75 : vector<4x1xi32>
    %cst_25 = arith.constant 0.000000e+00 : f32
    %77 = vector.shape_cast %74 : vector<4x1xi1> to vector<4x1xi1>
    %78 = vector.broadcast %77 : vector<4x1xi1> to vector<4x32xi1>
    %79 = vector.broadcast %cst_25 : f32 to vector<4x32xf32>
    %80 = arith.select %78, %44, %79 : vector<4x32xi1>, vector<4x32xf32>
    %cst_26 = arith.constant 0.000000e+00 : f32
    %81 = vector.shape_cast %76 : vector<4x1xi1> to vector<4x1xi1>
    %82 = vector.broadcast %81 : vector<4x1xi1> to vector<4x32xi1>
    %83 = vector.broadcast %cst_26 : f32 to vector<4x32xf32>
    %84 = arith.select %82, %72, %83 : vector<4x32xi1>, vector<4x32xf32>
    %85 = vector.shape_cast %74 : vector<4x1xi1> to vector<4x1xi1>
    %86 = vector.broadcast %85 : vector<4x1xi1> to vector<4x32xi1>
    %87 = arith.select %86, %44, %11 : vector<4x32xi1>, vector<4x32xf32>
    %88 = vector.shape_cast %76 : vector<4x1xi1> to vector<4x1xi1>
    %89 = vector.broadcast %88 : vector<4x1xi1> to vector<4x32xi1>
    %90 = arith.select %89, %72, %12 : vector<4x32xi1>, vector<4x32xf32>
    %cst_27 = arith.constant dense<0.000000e+00> : vector<4x96xf32>
    %91 = tpu.matmul %87, %7, %cst_27 {dimension_numbers = #tpu.dot_dimension_numbers<[1], [0], [0], [1], [0, 0, 1, 1], [], []>} : vector<4x32xf32>, vector<32x96xf32>, vector<4x96xf32> -> vector<4x96xf32>
    %cst_28 = arith.constant dense<0.000000e+00> : vector<4x96xf32>
    %92 = tpu.matmul %90, %8, %cst_28 {dimension_numbers = #tpu.dot_dimension_numbers<[1], [0], [0], [1], [0, 0, 1, 1], [], []>} : vector<4x32xf32>, vector<32x96xf32>, vector<4x96xf32> -> vector<4x96xf32>
    %93 = vector.extract_strided_slice %6 {offsets = [4, 0], sizes = [4, 96], strides = [1, 1]} : vector<32x192xf32> to vector<4x96xf32>
    %94 = vector.extract_strided_slice %6 {offsets = [24, 96], sizes = [4, 96], strides = [1, 1]} : vector<32x192xf32> to vector<4x96xf32>
    %95 = vector.extract_strided_slice %93 {offsets = [0, 0], sizes = [4, 32], strides = [1, 1]} : vector<4x96xf32> to vector<4x32xf32>
    %96 = vector.extract_strided_slice %91 {offsets = [0, 0], sizes = [4, 32], strides = [1, 1]} : vector<4x96xf32> to vector<4x32xf32>
    %97 = arith.addf %95, %96 : vector<4x32xf32>
    %98 = arith.negf %97 : vector<4x32xf32>
    %99 = math.exp %98 : vector<4x32xf32>
    %cst_29 = arith.constant 1.000000e+00 : f32
    %100 = vector.broadcast %cst_29 : f32 to vector<4x32xf32>
    %101 = arith.addf %100, %99 : vector<4x32xf32>
    %102 = arith.divf %100, %101 : vector<4x32xf32>
    %103 = vector.extract_strided_slice %93 {offsets = [0, 32], sizes = [4, 32], strides = [1, 1]} : vector<4x96xf32> to vector<4x32xf32>
    %104 = vector.extract_strided_slice %91 {offsets = [0, 32], sizes = [4, 32], strides = [1, 1]} : vector<4x96xf32> to vector<4x32xf32>
    %105 = arith.addf %103, %104 : vector<4x32xf32>
    %106 = arith.negf %105 : vector<4x32xf32>
    %107 = math.exp %106 : vector<4x32xf32>
    %cst_30 = arith.constant 1.000000e+00 : f32
    %108 = vector.broadcast %cst_30 : f32 to vector<4x32xf32>
    %109 = arith.addf %108, %107 : vector<4x32xf32>
    %110 = arith.divf %108, %109 : vector<4x32xf32>
    %111 = vector.extract_strided_slice %93 {offsets = [0, 64], sizes = [4, 32], strides = [1, 1]} : vector<4x96xf32> to vector<4x32xf32>
    %112 = vector.extract_strided_slice %91 {offsets = [0, 64], sizes = [4, 32], strides = [1, 1]} : vector<4x96xf32> to vector<4x32xf32>
    %113 = vector.broadcast %9 : vector<1x32xf32> to vector<4x32xf32>
    %114 = arith.addf %112, %113 : vector<4x32xf32>
    %115 = arith.mulf %102, %114 : vector<4x32xf32>
    %116 = arith.addf %111, %115 : vector<4x32xf32>
    %117 = math.tanh %116 : vector<4x32xf32>
    %cst_31 = arith.constant 1.000000e+00 : f32
    %118 = vector.broadcast %cst_31 : f32 to vector<4x32xf32>
    %119 = arith.subf %118, %110 : vector<4x32xf32>
    %120 = arith.mulf %119, %117 : vector<4x32xf32>
    %121 = arith.mulf %110, %87 : vector<4x32xf32>
    %122 = arith.addf %120, %121 : vector<4x32xf32>
    %123 = vector.extract_strided_slice %94 {offsets = [0, 0], sizes = [4, 32], strides = [1, 1]} : vector<4x96xf32> to vector<4x32xf32>
    %124 = vector.extract_strided_slice %92 {offsets = [0, 0], sizes = [4, 32], strides = [1, 1]} : vector<4x96xf32> to vector<4x32xf32>
    %125 = arith.addf %123, %124 : vector<4x32xf32>
    %126 = arith.negf %125 : vector<4x32xf32>
    %127 = math.exp %126 : vector<4x32xf32>
    %cst_32 = arith.constant 1.000000e+00 : f32
    %128 = vector.broadcast %cst_32 : f32 to vector<4x32xf32>
    %129 = arith.addf %128, %127 : vector<4x32xf32>
    %130 = arith.divf %128, %129 : vector<4x32xf32>
    %131 = vector.extract_strided_slice %94 {offsets = [0, 32], sizes = [4, 32], strides = [1, 1]} : vector<4x96xf32> to vector<4x32xf32>
    %132 = vector.extract_strided_slice %92 {offsets = [0, 32], sizes = [4, 32], strides = [1, 1]} : vector<4x96xf32> to vector<4x32xf32>
    %133 = arith.addf %131, %132 : vector<4x32xf32>
    %134 = arith.negf %133 : vector<4x32xf32>
    %135 = math.exp %134 : vector<4x32xf32>
    %cst_33 = arith.constant 1.000000e+00 : f32
    %136 = vector.broadcast %cst_33 : f32 to vector<4x32xf32>
    %137 = arith.addf %136, %135 : vector<4x32xf32>
    %138 = arith.divf %136, %137 : vector<4x32xf32>
    %139 = vector.extract_strided_slice %94 {offsets = [0, 64], sizes = [4, 32], strides = [1, 1]} : vector<4x96xf32> to vector<4x32xf32>
    %140 = vector.extract_strided_slice %92 {offsets = [0, 64], sizes = [4, 32], strides = [1, 1]} : vector<4x96xf32> to vector<4x32xf32>
    %141 = vector.broadcast %10 : vector<1x32xf32> to vector<4x32xf32>
    %142 = arith.addf %140, %141 : vector<4x32xf32>
    %143 = arith.mulf %130, %142 : vector<4x32xf32>
    %144 = arith.addf %139, %143 : vector<4x32xf32>
    %145 = math.tanh %144 : vector<4x32xf32>
    %cst_34 = arith.constant 1.000000e+00 : f32
    %146 = vector.broadcast %cst_34 : f32 to vector<4x32xf32>
    %147 = arith.subf %146, %138 : vector<4x32xf32>
    %148 = arith.mulf %147, %145 : vector<4x32xf32>
    %149 = arith.mulf %138, %90 : vector<4x32xf32>
    %150 = arith.addf %148, %149 : vector<4x32xf32>
    %c1_i32 = arith.constant 1 : i32
    %151 = vector.broadcast %c1_i32 : i32 to vector<4x1xi32>
    %152 = arith.cmpi sgt, %0, %151 : vector<4x1xi32>
    %c6_i32 = arith.constant 6 : i32
    %153 = vector.broadcast %c6_i32 : i32 to vector<4x1xi32>
    %154 = arith.cmpi sgt, %0, %153 : vector<4x1xi32>
    %cst_35 = arith.constant 0.000000e+00 : f32
    %155 = vector.shape_cast %152 : vector<4x1xi1> to vector<4x1xi1>
    %156 = vector.broadcast %155 : vector<4x1xi1> to vector<4x32xi1>
    %157 = vector.broadcast %cst_35 : f32 to vector<4x32xf32>
    %158 = arith.select %156, %122, %157 : vector<4x32xi1>, vector<4x32xf32>
    %cst_36 = arith.constant 0.000000e+00 : f32
    %159 = vector.shape_cast %154 : vector<4x1xi1> to vector<4x1xi1>
    %160 = vector.broadcast %159 : vector<4x1xi1> to vector<4x32xi1>
    %161 = vector.broadcast %cst_36 : f32 to vector<4x32xf32>
    %162 = arith.select %160, %150, %161 : vector<4x32xi1>, vector<4x32xf32>
    %163 = vector.shape_cast %152 : vector<4x1xi1> to vector<4x1xi1>
    %164 = vector.broadcast %163 : vector<4x1xi1> to vector<4x32xi1>
    %165 = arith.select %164, %122, %87 : vector<4x32xi1>, vector<4x32xf32>
    %166 = vector.shape_cast %154 : vector<4x1xi1> to vector<4x1xi1>
    %167 = vector.broadcast %166 : vector<4x1xi1> to vector<4x32xi1>
    %168 = arith.select %167, %150, %90 : vector<4x32xi1>, vector<4x32xf32>
    %cst_37 = arith.constant dense<0.000000e+00> : vector<4x96xf32>
    %169 = tpu.matmul %165, %7, %cst_37 {dimension_numbers = #tpu.dot_dimension_numbers<[1], [0], [0], [1], [0, 0, 1, 1], [], []>} : vector<4x32xf32>, vector<32x96xf32>, vector<4x96xf32> -> vector<4x96xf32>
    %cst_38 = arith.constant dense<0.000000e+00> : vector<4x96xf32>
    %170 = tpu.matmul %168, %8, %cst_38 {dimension_numbers = #tpu.dot_dimension_numbers<[1], [0], [0], [1], [0, 0, 1, 1], [], []>} : vector<4x32xf32>, vector<32x96xf32>, vector<4x96xf32> -> vector<4x96xf32>
    %171 = vector.extract_strided_slice %6 {offsets = [8, 0], sizes = [4, 96], strides = [1, 1]} : vector<32x192xf32> to vector<4x96xf32>
    %172 = vector.extract_strided_slice %6 {offsets = [20, 96], sizes = [4, 96], strides = [1, 1]} : vector<32x192xf32> to vector<4x96xf32>
    %173 = vector.extract_strided_slice %171 {offsets = [0, 0], sizes = [4, 32], strides = [1, 1]} : vector<4x96xf32> to vector<4x32xf32>
    %174 = vector.extract_strided_slice %169 {offsets = [0, 0], sizes = [4, 32], strides = [1, 1]} : vector<4x96xf32> to vector<4x32xf32>
    %175 = arith.addf %173, %174 : vector<4x32xf32>
    %176 = arith.negf %175 : vector<4x32xf32>
    %177 = math.exp %176 : vector<4x32xf32>
    %cst_39 = arith.constant 1.000000e+00 : f32
    %178 = vector.broadcast %cst_39 : f32 to vector<4x32xf32>
    %179 = arith.addf %178, %177 : vector<4x32xf32>
    %180 = arith.divf %178, %179 : vector<4x32xf32>
    %181 = vector.extract_strided_slice %171 {offsets = [0, 32], sizes = [4, 32], strides = [1, 1]} : vector<4x96xf32> to vector<4x32xf32>
    %182 = vector.extract_strided_slice %169 {offsets = [0, 32], sizes = [4, 32], strides = [1, 1]} : vector<4x96xf32> to vector<4x32xf32>
    %183 = arith.addf %181, %182 : vector<4x32xf32>
    %184 = arith.negf %183 : vector<4x32xf32>
    %185 = math.exp %184 : vector<4x32xf32>
    %cst_40 = arith.constant 1.000000e+00 : f32
    %186 = vector.broadcast %cst_40 : f32 to vector<4x32xf32>
    %187 = arith.addf %186, %185 : vector<4x32xf32>
    %188 = arith.divf %186, %187 : vector<4x32xf32>
    %189 = vector.extract_strided_slice %171 {offsets = [0, 64], sizes = [4, 32], strides = [1, 1]} : vector<4x96xf32> to vector<4x32xf32>
    %190 = vector.extract_strided_slice %169 {offsets = [0, 64], sizes = [4, 32], strides = [1, 1]} : vector<4x96xf32> to vector<4x32xf32>
    %191 = vector.broadcast %9 : vector<1x32xf32> to vector<4x32xf32>
    %192 = arith.addf %190, %191 : vector<4x32xf32>
    %193 = arith.mulf %180, %192 : vector<4x32xf32>
    %194 = arith.addf %189, %193 : vector<4x32xf32>
    %195 = math.tanh %194 : vector<4x32xf32>
    %cst_41 = arith.constant 1.000000e+00 : f32
    %196 = vector.broadcast %cst_41 : f32 to vector<4x32xf32>
    %197 = arith.subf %196, %188 : vector<4x32xf32>
    %198 = arith.mulf %197, %195 : vector<4x32xf32>
    %199 = arith.mulf %188, %165 : vector<4x32xf32>
    %200 = arith.addf %198, %199 : vector<4x32xf32>
    %201 = vector.extract_strided_slice %172 {offsets = [0, 0], sizes = [4, 32], strides = [1, 1]} : vector<4x96xf32> to vector<4x32xf32>
    %202 = vector.extract_strided_slice %170 {offsets = [0, 0], sizes = [4, 32], strides = [1, 1]} : vector<4x96xf32> to vector<4x32xf32>
    %203 = arith.addf %201, %202 : vector<4x32xf32>
    %204 = arith.negf %203 : vector<4x32xf32>
    %205 = math.exp %204 : vector<4x32xf32>
    %cst_42 = arith.constant 1.000000e+00 : f32
    %206 = vector.broadcast %cst_42 : f32 to vector<4x32xf32>
    %207 = arith.addf %206, %205 : vector<4x32xf32>
    %208 = arith.divf %206, %207 : vector<4x32xf32>
    %209 = vector.extract_strided_slice %172 {offsets = [0, 32], sizes = [4, 32], strides = [1, 1]} : vector<4x96xf32> to vector<4x32xf32>
    %210 = vector.extract_strided_slice %170 {offsets = [0, 32], sizes = [4, 32], strides = [1, 1]} : vector<4x96xf32> to vector<4x32xf32>
    %211 = arith.addf %209, %210 : vector<4x32xf32>
    %212 = arith.negf %211 : vector<4x32xf32>
    %213 = math.exp %212 : vector<4x32xf32>
    %cst_43 = arith.constant 1.000000e+00 : f32
    %214 = vector.broadcast %cst_43 : f32 to vector<4x32xf32>
    %215 = arith.addf %214, %213 : vector<4x32xf32>
    %216 = arith.divf %214, %215 : vector<4x32xf32>
    %217 = vector.extract_strided_slice %172 {offsets = [0, 64], sizes = [4, 32], strides = [1, 1]} : vector<4x96xf32> to vector<4x32xf32>
    %218 = vector.extract_strided_slice %170 {offsets = [0, 64], sizes = [4, 32], strides = [1, 1]} : vector<4x96xf32> to vector<4x32xf32>
    %219 = vector.broadcast %10 : vector<1x32xf32> to vector<4x32xf32>
    %220 = arith.addf %218, %219 : vector<4x32xf32>
    %221 = arith.mulf %208, %220 : vector<4x32xf32>
    %222 = arith.addf %217, %221 : vector<4x32xf32>
    %223 = math.tanh %222 : vector<4x32xf32>
    %cst_44 = arith.constant 1.000000e+00 : f32
    %224 = vector.broadcast %cst_44 : f32 to vector<4x32xf32>
    %225 = arith.subf %224, %216 : vector<4x32xf32>
    %226 = arith.mulf %225, %223 : vector<4x32xf32>
    %227 = arith.mulf %216, %168 : vector<4x32xf32>
    %228 = arith.addf %226, %227 : vector<4x32xf32>
    %c2_i32 = arith.constant 2 : i32
    %229 = vector.broadcast %c2_i32 : i32 to vector<4x1xi32>
    %230 = arith.cmpi sgt, %0, %229 : vector<4x1xi32>
    %c5_i32 = arith.constant 5 : i32
    %231 = vector.broadcast %c5_i32 : i32 to vector<4x1xi32>
    %232 = arith.cmpi sgt, %0, %231 : vector<4x1xi32>
    %cst_45 = arith.constant 0.000000e+00 : f32
    %233 = vector.shape_cast %230 : vector<4x1xi1> to vector<4x1xi1>
    %234 = vector.broadcast %233 : vector<4x1xi1> to vector<4x32xi1>
    %235 = vector.broadcast %cst_45 : f32 to vector<4x32xf32>
    %236 = arith.select %234, %200, %235 : vector<4x32xi1>, vector<4x32xf32>
    %cst_46 = arith.constant 0.000000e+00 : f32
    %237 = vector.shape_cast %232 : vector<4x1xi1> to vector<4x1xi1>
    %238 = vector.broadcast %237 : vector<4x1xi1> to vector<4x32xi1>
    %239 = vector.broadcast %cst_46 : f32 to vector<4x32xf32>
    %240 = arith.select %238, %228, %239 : vector<4x32xi1>, vector<4x32xf32>
    %241 = vector.shape_cast %230 : vector<4x1xi1> to vector<4x1xi1>
    %242 = vector.broadcast %241 : vector<4x1xi1> to vector<4x32xi1>
    %243 = arith.select %242, %200, %165 : vector<4x32xi1>, vector<4x32xf32>
    %244 = vector.shape_cast %232 : vector<4x1xi1> to vector<4x1xi1>
    %245 = vector.broadcast %244 : vector<4x1xi1> to vector<4x32xi1>
    %246 = arith.select %245, %228, %168 : vector<4x32xi1>, vector<4x32xf32>
    %cst_47 = arith.constant dense<0.000000e+00> : vector<4x96xf32>
    %247 = tpu.matmul %243, %7, %cst_47 {dimension_numbers = #tpu.dot_dimension_numbers<[1], [0], [0], [1], [0, 0, 1, 1], [], []>} : vector<4x32xf32>, vector<32x96xf32>, vector<4x96xf32> -> vector<4x96xf32>
    %cst_48 = arith.constant dense<0.000000e+00> : vector<4x96xf32>
    %248 = tpu.matmul %246, %8, %cst_48 {dimension_numbers = #tpu.dot_dimension_numbers<[1], [0], [0], [1], [0, 0, 1, 1], [], []>} : vector<4x32xf32>, vector<32x96xf32>, vector<4x96xf32> -> vector<4x96xf32>
    %249 = vector.extract_strided_slice %6 {offsets = [12, 0], sizes = [4, 96], strides = [1, 1]} : vector<32x192xf32> to vector<4x96xf32>
    %250 = vector.extract_strided_slice %6 {offsets = [16, 96], sizes = [4, 96], strides = [1, 1]} : vector<32x192xf32> to vector<4x96xf32>
    %251 = vector.extract_strided_slice %249 {offsets = [0, 0], sizes = [4, 32], strides = [1, 1]} : vector<4x96xf32> to vector<4x32xf32>
    %252 = vector.extract_strided_slice %247 {offsets = [0, 0], sizes = [4, 32], strides = [1, 1]} : vector<4x96xf32> to vector<4x32xf32>
    %253 = arith.addf %251, %252 : vector<4x32xf32>
    %254 = arith.negf %253 : vector<4x32xf32>
    %255 = math.exp %254 : vector<4x32xf32>
    %cst_49 = arith.constant 1.000000e+00 : f32
    %256 = vector.broadcast %cst_49 : f32 to vector<4x32xf32>
    %257 = arith.addf %256, %255 : vector<4x32xf32>
    %258 = arith.divf %256, %257 : vector<4x32xf32>
    %259 = vector.extract_strided_slice %249 {offsets = [0, 32], sizes = [4, 32], strides = [1, 1]} : vector<4x96xf32> to vector<4x32xf32>
    %260 = vector.extract_strided_slice %247 {offsets = [0, 32], sizes = [4, 32], strides = [1, 1]} : vector<4x96xf32> to vector<4x32xf32>
    %261 = arith.addf %259, %260 : vector<4x32xf32>
    %262 = arith.negf %261 : vector<4x32xf32>
    %263 = math.exp %262 : vector<4x32xf32>
    %cst_50 = arith.constant 1.000000e+00 : f32
    %264 = vector.broadcast %cst_50 : f32 to vector<4x32xf32>
    %265 = arith.addf %264, %263 : vector<4x32xf32>
    %266 = arith.divf %264, %265 : vector<4x32xf32>
    %267 = vector.extract_strided_slice %249 {offsets = [0, 64], sizes = [4, 32], strides = [1, 1]} : vector<4x96xf32> to vector<4x32xf32>
    %268 = vector.extract_strided_slice %247 {offsets = [0, 64], sizes = [4, 32], strides = [1, 1]} : vector<4x96xf32> to vector<4x32xf32>
    %269 = vector.broadcast %9 : vector<1x32xf32> to vector<4x32xf32>
    %270 = arith.addf %268, %269 : vector<4x32xf32>
    %271 = arith.mulf %258, %270 : vector<4x32xf32>
    %272 = arith.addf %267, %271 : vector<4x32xf32>
    %273 = math.tanh %272 : vector<4x32xf32>
    %cst_51 = arith.constant 1.000000e+00 : f32
    %274 = vector.broadcast %cst_51 : f32 to vector<4x32xf32>
    %275 = arith.subf %274, %266 : vector<4x32xf32>
    %276 = arith.mulf %275, %273 : vector<4x32xf32>
    %277 = arith.mulf %266, %243 : vector<4x32xf32>
    %278 = arith.addf %276, %277 : vector<4x32xf32>
    %279 = vector.extract_strided_slice %250 {offsets = [0, 0], sizes = [4, 32], strides = [1, 1]} : vector<4x96xf32> to vector<4x32xf32>
    %280 = vector.extract_strided_slice %248 {offsets = [0, 0], sizes = [4, 32], strides = [1, 1]} : vector<4x96xf32> to vector<4x32xf32>
    %281 = arith.addf %279, %280 : vector<4x32xf32>
    %282 = arith.negf %281 : vector<4x32xf32>
    %283 = math.exp %282 : vector<4x32xf32>
    %cst_52 = arith.constant 1.000000e+00 : f32
    %284 = vector.broadcast %cst_52 : f32 to vector<4x32xf32>
    %285 = arith.addf %284, %283 : vector<4x32xf32>
    %286 = arith.divf %284, %285 : vector<4x32xf32>
    %287 = vector.extract_strided_slice %250 {offsets = [0, 32], sizes = [4, 32], strides = [1, 1]} : vector<4x96xf32> to vector<4x32xf32>
    %288 = vector.extract_strided_slice %248 {offsets = [0, 32], sizes = [4, 32], strides = [1, 1]} : vector<4x96xf32> to vector<4x32xf32>
    %289 = arith.addf %287, %288 : vector<4x32xf32>
    %290 = arith.negf %289 : vector<4x32xf32>
    %291 = math.exp %290 : vector<4x32xf32>
    %cst_53 = arith.constant 1.000000e+00 : f32
    %292 = vector.broadcast %cst_53 : f32 to vector<4x32xf32>
    %293 = arith.addf %292, %291 : vector<4x32xf32>
    %294 = arith.divf %292, %293 : vector<4x32xf32>
    %295 = vector.extract_strided_slice %250 {offsets = [0, 64], sizes = [4, 32], strides = [1, 1]} : vector<4x96xf32> to vector<4x32xf32>
    %296 = vector.extract_strided_slice %248 {offsets = [0, 64], sizes = [4, 32], strides = [1, 1]} : vector<4x96xf32> to vector<4x32xf32>
    %297 = vector.broadcast %10 : vector<1x32xf32> to vector<4x32xf32>
    %298 = arith.addf %296, %297 : vector<4x32xf32>
    %299 = arith.mulf %286, %298 : vector<4x32xf32>
    %300 = arith.addf %295, %299 : vector<4x32xf32>
    %301 = math.tanh %300 : vector<4x32xf32>
    %cst_54 = arith.constant 1.000000e+00 : f32
    %302 = vector.broadcast %cst_54 : f32 to vector<4x32xf32>
    %303 = arith.subf %302, %294 : vector<4x32xf32>
    %304 = arith.mulf %303, %301 : vector<4x32xf32>
    %305 = arith.mulf %294, %246 : vector<4x32xf32>
    %306 = arith.addf %304, %305 : vector<4x32xf32>
    %c3_i32 = arith.constant 3 : i32
    %307 = vector.broadcast %c3_i32 : i32 to vector<4x1xi32>
    %308 = arith.cmpi sgt, %0, %307 : vector<4x1xi32>
    %c4_i32 = arith.constant 4 : i32
    %309 = vector.broadcast %c4_i32 : i32 to vector<4x1xi32>
    %310 = arith.cmpi sgt, %0, %309 : vector<4x1xi32>
    %cst_55 = arith.constant 0.000000e+00 : f32
    %311 = vector.shape_cast %308 : vector<4x1xi1> to vector<4x1xi1>
    %312 = vector.broadcast %311 : vector<4x1xi1> to vector<4x32xi1>
    %313 = vector.broadcast %cst_55 : f32 to vector<4x32xf32>
    %314 = arith.select %312, %278, %313 : vector<4x32xi1>, vector<4x32xf32>
    %cst_56 = arith.constant 0.000000e+00 : f32
    %315 = vector.shape_cast %310 : vector<4x1xi1> to vector<4x1xi1>
    %316 = vector.broadcast %315 : vector<4x1xi1> to vector<4x32xi1>
    %317 = vector.broadcast %cst_56 : f32 to vector<4x32xf32>
    %318 = arith.select %316, %306, %317 : vector<4x32xi1>, vector<4x32xf32>
    %319 = vector.shape_cast %308 : vector<4x1xi1> to vector<4x1xi1>
    %320 = vector.broadcast %319 : vector<4x1xi1> to vector<4x32xi1>
    %321 = arith.select %320, %278, %243 : vector<4x32xi1>, vector<4x32xf32>
    %322 = vector.shape_cast %310 : vector<4x1xi1> to vector<4x1xi1>
    %323 = vector.broadcast %322 : vector<4x1xi1> to vector<4x32xi1>
    %324 = arith.select %323, %306, %246 : vector<4x32xi1>, vector<4x32xf32>
    %cst_57 = arith.constant dense<0.000000e+00> : vector<4x96xf32>
    %325 = tpu.matmul %321, %7, %cst_57 {dimension_numbers = #tpu.dot_dimension_numbers<[1], [0], [0], [1], [0, 0, 1, 1], [], []>} : vector<4x32xf32>, vector<32x96xf32>, vector<4x96xf32> -> vector<4x96xf32>
    %cst_58 = arith.constant dense<0.000000e+00> : vector<4x96xf32>
    %326 = tpu.matmul %324, %8, %cst_58 {dimension_numbers = #tpu.dot_dimension_numbers<[1], [0], [0], [1], [0, 0, 1, 1], [], []>} : vector<4x32xf32>, vector<32x96xf32>, vector<4x96xf32> -> vector<4x96xf32>
    %327 = vector.extract_strided_slice %6 {offsets = [16, 0], sizes = [4, 96], strides = [1, 1]} : vector<32x192xf32> to vector<4x96xf32>
    %328 = vector.extract_strided_slice %6 {offsets = [12, 96], sizes = [4, 96], strides = [1, 1]} : vector<32x192xf32> to vector<4x96xf32>
    %329 = vector.extract_strided_slice %327 {offsets = [0, 0], sizes = [4, 32], strides = [1, 1]} : vector<4x96xf32> to vector<4x32xf32>
    %330 = vector.extract_strided_slice %325 {offsets = [0, 0], sizes = [4, 32], strides = [1, 1]} : vector<4x96xf32> to vector<4x32xf32>
    %331 = arith.addf %329, %330 : vector<4x32xf32>
    %332 = arith.negf %331 : vector<4x32xf32>
    %333 = math.exp %332 : vector<4x32xf32>
    %cst_59 = arith.constant 1.000000e+00 : f32
    %334 = vector.broadcast %cst_59 : f32 to vector<4x32xf32>
    %335 = arith.addf %334, %333 : vector<4x32xf32>
    %336 = arith.divf %334, %335 : vector<4x32xf32>
    %337 = vector.extract_strided_slice %327 {offsets = [0, 32], sizes = [4, 32], strides = [1, 1]} : vector<4x96xf32> to vector<4x32xf32>
    %338 = vector.extract_strided_slice %325 {offsets = [0, 32], sizes = [4, 32], strides = [1, 1]} : vector<4x96xf32> to vector<4x32xf32>
    %339 = arith.addf %337, %338 : vector<4x32xf32>
    %340 = arith.negf %339 : vector<4x32xf32>
    %341 = math.exp %340 : vector<4x32xf32>
    %cst_60 = arith.constant 1.000000e+00 : f32
    %342 = vector.broadcast %cst_60 : f32 to vector<4x32xf32>
    %343 = arith.addf %342, %341 : vector<4x32xf32>
    %344 = arith.divf %342, %343 : vector<4x32xf32>
    %345 = vector.extract_strided_slice %327 {offsets = [0, 64], sizes = [4, 32], strides = [1, 1]} : vector<4x96xf32> to vector<4x32xf32>
    %346 = vector.extract_strided_slice %325 {offsets = [0, 64], sizes = [4, 32], strides = [1, 1]} : vector<4x96xf32> to vector<4x32xf32>
    %347 = vector.broadcast %9 : vector<1x32xf32> to vector<4x32xf32>
    %348 = arith.addf %346, %347 : vector<4x32xf32>
    %349 = arith.mulf %336, %348 : vector<4x32xf32>
    %350 = arith.addf %345, %349 : vector<4x32xf32>
    %351 = math.tanh %350 : vector<4x32xf32>
    %cst_61 = arith.constant 1.000000e+00 : f32
    %352 = vector.broadcast %cst_61 : f32 to vector<4x32xf32>
    %353 = arith.subf %352, %344 : vector<4x32xf32>
    %354 = arith.mulf %353, %351 : vector<4x32xf32>
    %355 = arith.mulf %344, %321 : vector<4x32xf32>
    %356 = arith.addf %354, %355 : vector<4x32xf32>
    %357 = vector.extract_strided_slice %328 {offsets = [0, 0], sizes = [4, 32], strides = [1, 1]} : vector<4x96xf32> to vector<4x32xf32>
    %358 = vector.extract_strided_slice %326 {offsets = [0, 0], sizes = [4, 32], strides = [1, 1]} : vector<4x96xf32> to vector<4x32xf32>
    %359 = arith.addf %357, %358 : vector<4x32xf32>
    %360 = arith.negf %359 : vector<4x32xf32>
    %361 = math.exp %360 : vector<4x32xf32>
    %cst_62 = arith.constant 1.000000e+00 : f32
    %362 = vector.broadcast %cst_62 : f32 to vector<4x32xf32>
    %363 = arith.addf %362, %361 : vector<4x32xf32>
    %364 = arith.divf %362, %363 : vector<4x32xf32>
    %365 = vector.extract_strided_slice %328 {offsets = [0, 32], sizes = [4, 32], strides = [1, 1]} : vector<4x96xf32> to vector<4x32xf32>
    %366 = vector.extract_strided_slice %326 {offsets = [0, 32], sizes = [4, 32], strides = [1, 1]} : vector<4x96xf32> to vector<4x32xf32>
    %367 = arith.addf %365, %366 : vector<4x32xf32>
    %368 = arith.negf %367 : vector<4x32xf32>
    %369 = math.exp %368 : vector<4x32xf32>
    %cst_63 = arith.constant 1.000000e+00 : f32
    %370 = vector.broadcast %cst_63 : f32 to vector<4x32xf32>
    %371 = arith.addf %370, %369 : vector<4x32xf32>
    %372 = arith.divf %370, %371 : vector<4x32xf32>
    %373 = vector.extract_strided_slice %328 {offsets = [0, 64], sizes = [4, 32], strides = [1, 1]} : vector<4x96xf32> to vector<4x32xf32>
    %374 = vector.extract_strided_slice %326 {offsets = [0, 64], sizes = [4, 32], strides = [1, 1]} : vector<4x96xf32> to vector<4x32xf32>
    %375 = vector.broadcast %10 : vector<1x32xf32> to vector<4x32xf32>
    %376 = arith.addf %374, %375 : vector<4x32xf32>
    %377 = arith.mulf %364, %376 : vector<4x32xf32>
    %378 = arith.addf %373, %377 : vector<4x32xf32>
    %379 = math.tanh %378 : vector<4x32xf32>
    %cst_64 = arith.constant 1.000000e+00 : f32
    %380 = vector.broadcast %cst_64 : f32 to vector<4x32xf32>
    %381 = arith.subf %380, %372 : vector<4x32xf32>
    %382 = arith.mulf %381, %379 : vector<4x32xf32>
    %383 = arith.mulf %372, %324 : vector<4x32xf32>
    %384 = arith.addf %382, %383 : vector<4x32xf32>
    %c4_i32_65 = arith.constant 4 : i32
    %385 = vector.broadcast %c4_i32_65 : i32 to vector<4x1xi32>
    %386 = arith.cmpi sgt, %0, %385 : vector<4x1xi32>
    %c3_i32_66 = arith.constant 3 : i32
    %387 = vector.broadcast %c3_i32_66 : i32 to vector<4x1xi32>
    %388 = arith.cmpi sgt, %0, %387 : vector<4x1xi32>
    %cst_67 = arith.constant 0.000000e+00 : f32
    %389 = vector.shape_cast %386 : vector<4x1xi1> to vector<4x1xi1>
    %390 = vector.broadcast %389 : vector<4x1xi1> to vector<4x32xi1>
    %391 = vector.broadcast %cst_67 : f32 to vector<4x32xf32>
    %392 = arith.select %390, %356, %391 : vector<4x32xi1>, vector<4x32xf32>
    %cst_68 = arith.constant 0.000000e+00 : f32
    %393 = vector.shape_cast %388 : vector<4x1xi1> to vector<4x1xi1>
    %394 = vector.broadcast %393 : vector<4x1xi1> to vector<4x32xi1>
    %395 = vector.broadcast %cst_68 : f32 to vector<4x32xf32>
    %396 = arith.select %394, %384, %395 : vector<4x32xi1>, vector<4x32xf32>
    %397 = vector.shape_cast %386 : vector<4x1xi1> to vector<4x1xi1>
    %398 = vector.broadcast %397 : vector<4x1xi1> to vector<4x32xi1>
    %399 = arith.select %398, %356, %321 : vector<4x32xi1>, vector<4x32xf32>
    %400 = vector.shape_cast %388 : vector<4x1xi1> to vector<4x1xi1>
    %401 = vector.broadcast %400 : vector<4x1xi1> to vector<4x32xi1>
    %402 = arith.select %401, %384, %324 : vector<4x32xi1>, vector<4x32xf32>
    %cst_69 = arith.constant dense<0.000000e+00> : vector<4x96xf32>
    %403 = tpu.matmul %399, %7, %cst_69 {dimension_numbers = #tpu.dot_dimension_numbers<[1], [0], [0], [1], [0, 0, 1, 1], [], []>} : vector<4x32xf32>, vector<32x96xf32>, vector<4x96xf32> -> vector<4x96xf32>
    %cst_70 = arith.constant dense<0.000000e+00> : vector<4x96xf32>
    %404 = tpu.matmul %402, %8, %cst_70 {dimension_numbers = #tpu.dot_dimension_numbers<[1], [0], [0], [1], [0, 0, 1, 1], [], []>} : vector<4x32xf32>, vector<32x96xf32>, vector<4x96xf32> -> vector<4x96xf32>
    %405 = vector.extract_strided_slice %6 {offsets = [20, 0], sizes = [4, 96], strides = [1, 1]} : vector<32x192xf32> to vector<4x96xf32>
    %406 = vector.extract_strided_slice %6 {offsets = [8, 96], sizes = [4, 96], strides = [1, 1]} : vector<32x192xf32> to vector<4x96xf32>
    %407 = vector.extract_strided_slice %405 {offsets = [0, 0], sizes = [4, 32], strides = [1, 1]} : vector<4x96xf32> to vector<4x32xf32>
    %408 = vector.extract_strided_slice %403 {offsets = [0, 0], sizes = [4, 32], strides = [1, 1]} : vector<4x96xf32> to vector<4x32xf32>
    %409 = arith.addf %407, %408 : vector<4x32xf32>
    %410 = arith.negf %409 : vector<4x32xf32>
    %411 = math.exp %410 : vector<4x32xf32>
    %cst_71 = arith.constant 1.000000e+00 : f32
    %412 = vector.broadcast %cst_71 : f32 to vector<4x32xf32>
    %413 = arith.addf %412, %411 : vector<4x32xf32>
    %414 = arith.divf %412, %413 : vector<4x32xf32>
    %415 = vector.extract_strided_slice %405 {offsets = [0, 32], sizes = [4, 32], strides = [1, 1]} : vector<4x96xf32> to vector<4x32xf32>
    %416 = vector.extract_strided_slice %403 {offsets = [0, 32], sizes = [4, 32], strides = [1, 1]} : vector<4x96xf32> to vector<4x32xf32>
    %417 = arith.addf %415, %416 : vector<4x32xf32>
    %418 = arith.negf %417 : vector<4x32xf32>
    %419 = math.exp %418 : vector<4x32xf32>
    %cst_72 = arith.constant 1.000000e+00 : f32
    %420 = vector.broadcast %cst_72 : f32 to vector<4x32xf32>
    %421 = arith.addf %420, %419 : vector<4x32xf32>
    %422 = arith.divf %420, %421 : vector<4x32xf32>
    %423 = vector.extract_strided_slice %405 {offsets = [0, 64], sizes = [4, 32], strides = [1, 1]} : vector<4x96xf32> to vector<4x32xf32>
    %424 = vector.extract_strided_slice %403 {offsets = [0, 64], sizes = [4, 32], strides = [1, 1]} : vector<4x96xf32> to vector<4x32xf32>
    %425 = vector.broadcast %9 : vector<1x32xf32> to vector<4x32xf32>
    %426 = arith.addf %424, %425 : vector<4x32xf32>
    %427 = arith.mulf %414, %426 : vector<4x32xf32>
    %428 = arith.addf %423, %427 : vector<4x32xf32>
    %429 = math.tanh %428 : vector<4x32xf32>
    %cst_73 = arith.constant 1.000000e+00 : f32
    %430 = vector.broadcast %cst_73 : f32 to vector<4x32xf32>
    %431 = arith.subf %430, %422 : vector<4x32xf32>
    %432 = arith.mulf %431, %429 : vector<4x32xf32>
    %433 = arith.mulf %422, %399 : vector<4x32xf32>
    %434 = arith.addf %432, %433 : vector<4x32xf32>
    %435 = vector.extract_strided_slice %406 {offsets = [0, 0], sizes = [4, 32], strides = [1, 1]} : vector<4x96xf32> to vector<4x32xf32>
    %436 = vector.extract_strided_slice %404 {offsets = [0, 0], sizes = [4, 32], strides = [1, 1]} : vector<4x96xf32> to vector<4x32xf32>
    %437 = arith.addf %435, %436 : vector<4x32xf32>
    %438 = arith.negf %437 : vector<4x32xf32>
    %439 = math.exp %438 : vector<4x32xf32>
    %cst_74 = arith.constant 1.000000e+00 : f32
    %440 = vector.broadcast %cst_74 : f32 to vector<4x32xf32>
    %441 = arith.addf %440, %439 : vector<4x32xf32>
    %442 = arith.divf %440, %441 : vector<4x32xf32>
    %443 = vector.extract_strided_slice %406 {offsets = [0, 32], sizes = [4, 32], strides = [1, 1]} : vector<4x96xf32> to vector<4x32xf32>
    %444 = vector.extract_strided_slice %404 {offsets = [0, 32], sizes = [4, 32], strides = [1, 1]} : vector<4x96xf32> to vector<4x32xf32>
    %445 = arith.addf %443, %444 : vector<4x32xf32>
    %446 = arith.negf %445 : vector<4x32xf32>
    %447 = math.exp %446 : vector<4x32xf32>
    %cst_75 = arith.constant 1.000000e+00 : f32
    %448 = vector.broadcast %cst_75 : f32 to vector<4x32xf32>
    %449 = arith.addf %448, %447 : vector<4x32xf32>
    %450 = arith.divf %448, %449 : vector<4x32xf32>
    %451 = vector.extract_strided_slice %406 {offsets = [0, 64], sizes = [4, 32], strides = [1, 1]} : vector<4x96xf32> to vector<4x32xf32>
    %452 = vector.extract_strided_slice %404 {offsets = [0, 64], sizes = [4, 32], strides = [1, 1]} : vector<4x96xf32> to vector<4x32xf32>
    %453 = vector.broadcast %10 : vector<1x32xf32> to vector<4x32xf32>
    %454 = arith.addf %452, %453 : vector<4x32xf32>
    %455 = arith.mulf %442, %454 : vector<4x32xf32>
    %456 = arith.addf %451, %455 : vector<4x32xf32>
    %457 = math.tanh %456 : vector<4x32xf32>
    %cst_76 = arith.constant 1.000000e+00 : f32
    %458 = vector.broadcast %cst_76 : f32 to vector<4x32xf32>
    %459 = arith.subf %458, %450 : vector<4x32xf32>
    %460 = arith.mulf %459, %457 : vector<4x32xf32>
    %461 = arith.mulf %450, %402 : vector<4x32xf32>
    %462 = arith.addf %460, %461 : vector<4x32xf32>
    %c5_i32_77 = arith.constant 5 : i32
    %463 = vector.broadcast %c5_i32_77 : i32 to vector<4x1xi32>
    %464 = arith.cmpi sgt, %0, %463 : vector<4x1xi32>
    %c2_i32_78 = arith.constant 2 : i32
    %465 = vector.broadcast %c2_i32_78 : i32 to vector<4x1xi32>
    %466 = arith.cmpi sgt, %0, %465 : vector<4x1xi32>
    %cst_79 = arith.constant 0.000000e+00 : f32
    %467 = vector.shape_cast %464 : vector<4x1xi1> to vector<4x1xi1>
    %468 = vector.broadcast %467 : vector<4x1xi1> to vector<4x32xi1>
    %469 = vector.broadcast %cst_79 : f32 to vector<4x32xf32>
    %470 = arith.select %468, %434, %469 : vector<4x32xi1>, vector<4x32xf32>
    %cst_80 = arith.constant 0.000000e+00 : f32
    %471 = vector.shape_cast %466 : vector<4x1xi1> to vector<4x1xi1>
    %472 = vector.broadcast %471 : vector<4x1xi1> to vector<4x32xi1>
    %473 = vector.broadcast %cst_80 : f32 to vector<4x32xf32>
    %474 = arith.select %472, %462, %473 : vector<4x32xi1>, vector<4x32xf32>
    %475 = vector.shape_cast %464 : vector<4x1xi1> to vector<4x1xi1>
    %476 = vector.broadcast %475 : vector<4x1xi1> to vector<4x32xi1>
    %477 = arith.select %476, %434, %399 : vector<4x32xi1>, vector<4x32xf32>
    %478 = vector.shape_cast %466 : vector<4x1xi1> to vector<4x1xi1>
    %479 = vector.broadcast %478 : vector<4x1xi1> to vector<4x32xi1>
    %480 = arith.select %479, %462, %402 : vector<4x32xi1>, vector<4x32xf32>
    %cst_81 = arith.constant dense<0.000000e+00> : vector<4x96xf32>
    %481 = tpu.matmul %477, %7, %cst_81 {dimension_numbers = #tpu.dot_dimension_numbers<[1], [0], [0], [1], [0, 0, 1, 1], [], []>} : vector<4x32xf32>, vector<32x96xf32>, vector<4x96xf32> -> vector<4x96xf32>
    %cst_82 = arith.constant dense<0.000000e+00> : vector<4x96xf32>
    %482 = tpu.matmul %480, %8, %cst_82 {dimension_numbers = #tpu.dot_dimension_numbers<[1], [0], [0], [1], [0, 0, 1, 1], [], []>} : vector<4x32xf32>, vector<32x96xf32>, vector<4x96xf32> -> vector<4x96xf32>
    %483 = vector.extract_strided_slice %6 {offsets = [24, 0], sizes = [4, 96], strides = [1, 1]} : vector<32x192xf32> to vector<4x96xf32>
    %484 = vector.extract_strided_slice %6 {offsets = [4, 96], sizes = [4, 96], strides = [1, 1]} : vector<32x192xf32> to vector<4x96xf32>
    %485 = vector.extract_strided_slice %483 {offsets = [0, 0], sizes = [4, 32], strides = [1, 1]} : vector<4x96xf32> to vector<4x32xf32>
    %486 = vector.extract_strided_slice %481 {offsets = [0, 0], sizes = [4, 32], strides = [1, 1]} : vector<4x96xf32> to vector<4x32xf32>
    %487 = arith.addf %485, %486 : vector<4x32xf32>
    %488 = arith.negf %487 : vector<4x32xf32>
    %489 = math.exp %488 : vector<4x32xf32>
    %cst_83 = arith.constant 1.000000e+00 : f32
    %490 = vector.broadcast %cst_83 : f32 to vector<4x32xf32>
    %491 = arith.addf %490, %489 : vector<4x32xf32>
    %492 = arith.divf %490, %491 : vector<4x32xf32>
    %493 = vector.extract_strided_slice %483 {offsets = [0, 32], sizes = [4, 32], strides = [1, 1]} : vector<4x96xf32> to vector<4x32xf32>
    %494 = vector.extract_strided_slice %481 {offsets = [0, 32], sizes = [4, 32], strides = [1, 1]} : vector<4x96xf32> to vector<4x32xf32>
    %495 = arith.addf %493, %494 : vector<4x32xf32>
    %496 = arith.negf %495 : vector<4x32xf32>
    %497 = math.exp %496 : vector<4x32xf32>
    %cst_84 = arith.constant 1.000000e+00 : f32
    %498 = vector.broadcast %cst_84 : f32 to vector<4x32xf32>
    %499 = arith.addf %498, %497 : vector<4x32xf32>
    %500 = arith.divf %498, %499 : vector<4x32xf32>
    %501 = vector.extract_strided_slice %483 {offsets = [0, 64], sizes = [4, 32], strides = [1, 1]} : vector<4x96xf32> to vector<4x32xf32>
    %502 = vector.extract_strided_slice %481 {offsets = [0, 64], sizes = [4, 32], strides = [1, 1]} : vector<4x96xf32> to vector<4x32xf32>
    %503 = vector.broadcast %9 : vector<1x32xf32> to vector<4x32xf32>
    %504 = arith.addf %502, %503 : vector<4x32xf32>
    %505 = arith.mulf %492, %504 : vector<4x32xf32>
    %506 = arith.addf %501, %505 : vector<4x32xf32>
    %507 = math.tanh %506 : vector<4x32xf32>
    %cst_85 = arith.constant 1.000000e+00 : f32
    %508 = vector.broadcast %cst_85 : f32 to vector<4x32xf32>
    %509 = arith.subf %508, %500 : vector<4x32xf32>
    %510 = arith.mulf %509, %507 : vector<4x32xf32>
    %511 = arith.mulf %500, %477 : vector<4x32xf32>
    %512 = arith.addf %510, %511 : vector<4x32xf32>
    %513 = vector.extract_strided_slice %484 {offsets = [0, 0], sizes = [4, 32], strides = [1, 1]} : vector<4x96xf32> to vector<4x32xf32>
    %514 = vector.extract_strided_slice %482 {offsets = [0, 0], sizes = [4, 32], strides = [1, 1]} : vector<4x96xf32> to vector<4x32xf32>
    %515 = arith.addf %513, %514 : vector<4x32xf32>
    %516 = arith.negf %515 : vector<4x32xf32>
    %517 = math.exp %516 : vector<4x32xf32>
    %cst_86 = arith.constant 1.000000e+00 : f32
    %518 = vector.broadcast %cst_86 : f32 to vector<4x32xf32>
    %519 = arith.addf %518, %517 : vector<4x32xf32>
    %520 = arith.divf %518, %519 : vector<4x32xf32>
    %521 = vector.extract_strided_slice %484 {offsets = [0, 32], sizes = [4, 32], strides = [1, 1]} : vector<4x96xf32> to vector<4x32xf32>
    %522 = vector.extract_strided_slice %482 {offsets = [0, 32], sizes = [4, 32], strides = [1, 1]} : vector<4x96xf32> to vector<4x32xf32>
    %523 = arith.addf %521, %522 : vector<4x32xf32>
    %524 = arith.negf %523 : vector<4x32xf32>
    %525 = math.exp %524 : vector<4x32xf32>
    %cst_87 = arith.constant 1.000000e+00 : f32
    %526 = vector.broadcast %cst_87 : f32 to vector<4x32xf32>
    %527 = arith.addf %526, %525 : vector<4x32xf32>
    %528 = arith.divf %526, %527 : vector<4x32xf32>
    %529 = vector.extract_strided_slice %484 {offsets = [0, 64], sizes = [4, 32], strides = [1, 1]} : vector<4x96xf32> to vector<4x32xf32>
    %530 = vector.extract_strided_slice %482 {offsets = [0, 64], sizes = [4, 32], strides = [1, 1]} : vector<4x96xf32> to vector<4x32xf32>
    %531 = vector.broadcast %10 : vector<1x32xf32> to vector<4x32xf32>
    %532 = arith.addf %530, %531 : vector<4x32xf32>
    %533 = arith.mulf %520, %532 : vector<4x32xf32>
    %534 = arith.addf %529, %533 : vector<4x32xf32>
    %535 = math.tanh %534 : vector<4x32xf32>
    %cst_88 = arith.constant 1.000000e+00 : f32
    %536 = vector.broadcast %cst_88 : f32 to vector<4x32xf32>
    %537 = arith.subf %536, %528 : vector<4x32xf32>
    %538 = arith.mulf %537, %535 : vector<4x32xf32>
    %539 = arith.mulf %528, %480 : vector<4x32xf32>
    %540 = arith.addf %538, %539 : vector<4x32xf32>
    %c6_i32_89 = arith.constant 6 : i32
    %541 = vector.broadcast %c6_i32_89 : i32 to vector<4x1xi32>
    %542 = arith.cmpi sgt, %0, %541 : vector<4x1xi32>
    %c1_i32_90 = arith.constant 1 : i32
    %543 = vector.broadcast %c1_i32_90 : i32 to vector<4x1xi32>
    %544 = arith.cmpi sgt, %0, %543 : vector<4x1xi32>
    %cst_91 = arith.constant 0.000000e+00 : f32
    %545 = vector.shape_cast %542 : vector<4x1xi1> to vector<4x1xi1>
    %546 = vector.broadcast %545 : vector<4x1xi1> to vector<4x32xi1>
    %547 = vector.broadcast %cst_91 : f32 to vector<4x32xf32>
    %548 = arith.select %546, %512, %547 : vector<4x32xi1>, vector<4x32xf32>
    %cst_92 = arith.constant 0.000000e+00 : f32
    %549 = vector.shape_cast %544 : vector<4x1xi1> to vector<4x1xi1>
    %550 = vector.broadcast %549 : vector<4x1xi1> to vector<4x32xi1>
    %551 = vector.broadcast %cst_92 : f32 to vector<4x32xf32>
    %552 = arith.select %550, %540, %551 : vector<4x32xi1>, vector<4x32xf32>
    %553 = vector.shape_cast %542 : vector<4x1xi1> to vector<4x1xi1>
    %554 = vector.broadcast %553 : vector<4x1xi1> to vector<4x32xi1>
    %555 = arith.select %554, %512, %477 : vector<4x32xi1>, vector<4x32xf32>
    %556 = vector.shape_cast %544 : vector<4x1xi1> to vector<4x1xi1>
    %557 = vector.broadcast %556 : vector<4x1xi1> to vector<4x32xi1>
    %558 = arith.select %557, %540, %480 : vector<4x32xi1>, vector<4x32xf32>
    %cst_93 = arith.constant dense<0.000000e+00> : vector<4x96xf32>
    %559 = tpu.matmul %555, %7, %cst_93 {dimension_numbers = #tpu.dot_dimension_numbers<[1], [0], [0], [1], [0, 0, 1, 1], [], []>} : vector<4x32xf32>, vector<32x96xf32>, vector<4x96xf32> -> vector<4x96xf32>
    %cst_94 = arith.constant dense<0.000000e+00> : vector<4x96xf32>
    %560 = tpu.matmul %558, %8, %cst_94 {dimension_numbers = #tpu.dot_dimension_numbers<[1], [0], [0], [1], [0, 0, 1, 1], [], []>} : vector<4x32xf32>, vector<32x96xf32>, vector<4x96xf32> -> vector<4x96xf32>
    %561 = vector.extract_strided_slice %6 {offsets = [28, 0], sizes = [4, 96], strides = [1, 1]} : vector<32x192xf32> to vector<4x96xf32>
    %562 = vector.extract_strided_slice %6 {offsets = [0, 96], sizes = [4, 96], strides = [1, 1]} : vector<32x192xf32> to vector<4x96xf32>
    %563 = vector.extract_strided_slice %561 {offsets = [0, 0], sizes = [4, 32], strides = [1, 1]} : vector<4x96xf32> to vector<4x32xf32>
    %564 = vector.extract_strided_slice %559 {offsets = [0, 0], sizes = [4, 32], strides = [1, 1]} : vector<4x96xf32> to vector<4x32xf32>
    %565 = arith.addf %563, %564 : vector<4x32xf32>
    %566 = arith.negf %565 : vector<4x32xf32>
    %567 = math.exp %566 : vector<4x32xf32>
    %cst_95 = arith.constant 1.000000e+00 : f32
    %568 = vector.broadcast %cst_95 : f32 to vector<4x32xf32>
    %569 = arith.addf %568, %567 : vector<4x32xf32>
    %570 = arith.divf %568, %569 : vector<4x32xf32>
    %571 = vector.extract_strided_slice %561 {offsets = [0, 32], sizes = [4, 32], strides = [1, 1]} : vector<4x96xf32> to vector<4x32xf32>
    %572 = vector.extract_strided_slice %559 {offsets = [0, 32], sizes = [4, 32], strides = [1, 1]} : vector<4x96xf32> to vector<4x32xf32>
    %573 = arith.addf %571, %572 : vector<4x32xf32>
    %574 = arith.negf %573 : vector<4x32xf32>
    %575 = math.exp %574 : vector<4x32xf32>
    %cst_96 = arith.constant 1.000000e+00 : f32
    %576 = vector.broadcast %cst_96 : f32 to vector<4x32xf32>
    %577 = arith.addf %576, %575 : vector<4x32xf32>
    %578 = arith.divf %576, %577 : vector<4x32xf32>
    %579 = vector.extract_strided_slice %561 {offsets = [0, 64], sizes = [4, 32], strides = [1, 1]} : vector<4x96xf32> to vector<4x32xf32>
    %580 = vector.extract_strided_slice %559 {offsets = [0, 64], sizes = [4, 32], strides = [1, 1]} : vector<4x96xf32> to vector<4x32xf32>
    %581 = vector.broadcast %9 : vector<1x32xf32> to vector<4x32xf32>
    %582 = arith.addf %580, %581 : vector<4x32xf32>
    %583 = arith.mulf %570, %582 : vector<4x32xf32>
    %584 = arith.addf %579, %583 : vector<4x32xf32>
    %585 = math.tanh %584 : vector<4x32xf32>
    %cst_97 = arith.constant 1.000000e+00 : f32
    %586 = vector.broadcast %cst_97 : f32 to vector<4x32xf32>
    %587 = arith.subf %586, %578 : vector<4x32xf32>
    %588 = arith.mulf %587, %585 : vector<4x32xf32>
    %589 = arith.mulf %578, %555 : vector<4x32xf32>
    %590 = arith.addf %588, %589 : vector<4x32xf32>
    %591 = vector.extract_strided_slice %562 {offsets = [0, 0], sizes = [4, 32], strides = [1, 1]} : vector<4x96xf32> to vector<4x32xf32>
    %592 = vector.extract_strided_slice %560 {offsets = [0, 0], sizes = [4, 32], strides = [1, 1]} : vector<4x96xf32> to vector<4x32xf32>
    %593 = arith.addf %591, %592 : vector<4x32xf32>
    %594 = arith.negf %593 : vector<4x32xf32>
    %595 = math.exp %594 : vector<4x32xf32>
    %cst_98 = arith.constant 1.000000e+00 : f32
    %596 = vector.broadcast %cst_98 : f32 to vector<4x32xf32>
    %597 = arith.addf %596, %595 : vector<4x32xf32>
    %598 = arith.divf %596, %597 : vector<4x32xf32>
    %599 = vector.extract_strided_slice %562 {offsets = [0, 32], sizes = [4, 32], strides = [1, 1]} : vector<4x96xf32> to vector<4x32xf32>
    %600 = vector.extract_strided_slice %560 {offsets = [0, 32], sizes = [4, 32], strides = [1, 1]} : vector<4x96xf32> to vector<4x32xf32>
    %601 = arith.addf %599, %600 : vector<4x32xf32>
    %602 = arith.negf %601 : vector<4x32xf32>
    %603 = math.exp %602 : vector<4x32xf32>
    %cst_99 = arith.constant 1.000000e+00 : f32
    %604 = vector.broadcast %cst_99 : f32 to vector<4x32xf32>
    %605 = arith.addf %604, %603 : vector<4x32xf32>
    %606 = arith.divf %604, %605 : vector<4x32xf32>
    %607 = vector.extract_strided_slice %562 {offsets = [0, 64], sizes = [4, 32], strides = [1, 1]} : vector<4x96xf32> to vector<4x32xf32>
    %608 = vector.extract_strided_slice %560 {offsets = [0, 64], sizes = [4, 32], strides = [1, 1]} : vector<4x96xf32> to vector<4x32xf32>
    %609 = vector.broadcast %10 : vector<1x32xf32> to vector<4x32xf32>
    %610 = arith.addf %608, %609 : vector<4x32xf32>
    %611 = arith.mulf %598, %610 : vector<4x32xf32>
    %612 = arith.addf %607, %611 : vector<4x32xf32>
    %613 = math.tanh %612 : vector<4x32xf32>
    %cst_100 = arith.constant 1.000000e+00 : f32
    %614 = vector.broadcast %cst_100 : f32 to vector<4x32xf32>
    %615 = arith.subf %614, %606 : vector<4x32xf32>
    %616 = arith.mulf %615, %613 : vector<4x32xf32>
    %617 = arith.mulf %606, %558 : vector<4x32xf32>
    %618 = arith.addf %616, %617 : vector<4x32xf32>
    %c7_i32_101 = arith.constant 7 : i32
    %619 = vector.broadcast %c7_i32_101 : i32 to vector<4x1xi32>
    %620 = arith.cmpi sgt, %0, %619 : vector<4x1xi32>
    %c0_i32_102 = arith.constant 0 : i32
    %621 = vector.broadcast %c0_i32_102 : i32 to vector<4x1xi32>
    %622 = arith.cmpi sgt, %0, %621 : vector<4x1xi32>
    %cst_103 = arith.constant 0.000000e+00 : f32
    %623 = vector.shape_cast %620 : vector<4x1xi1> to vector<4x1xi1>
    %624 = vector.broadcast %623 : vector<4x1xi1> to vector<4x32xi1>
    %625 = vector.broadcast %cst_103 : f32 to vector<4x32xf32>
    %626 = arith.select %624, %590, %625 : vector<4x32xi1>, vector<4x32xf32>
    %cst_104 = arith.constant 0.000000e+00 : f32
    %627 = vector.shape_cast %622 : vector<4x1xi1> to vector<4x1xi1>
    %628 = vector.broadcast %627 : vector<4x1xi1> to vector<4x32xi1>
    %629 = vector.broadcast %cst_104 : f32 to vector<4x32xf32>
    %630 = arith.select %628, %618, %629 : vector<4x32xi1>, vector<4x32xf32>
    %631 = vector.shape_cast %620 : vector<4x1xi1> to vector<4x1xi1>
    %632 = vector.broadcast %631 : vector<4x1xi1> to vector<4x32xi1>
    %633 = arith.select %632, %590, %555 : vector<4x32xi1>, vector<4x32xf32>
    %634 = vector.shape_cast %622 : vector<4x1xi1> to vector<4x1xi1>
    %635 = vector.broadcast %634 : vector<4x1xi1> to vector<4x32xi1>
    %636 = arith.select %635, %618, %558 : vector<4x32xi1>, vector<4x32xf32>
    %637 = arith.addf %80, %630 : vector<4x32xf32>
    %638 = arith.addf %158, %552 : vector<4x32xf32>
    %639 = arith.addf %236, %474 : vector<4x32xf32>
    %640 = arith.addf %314, %396 : vector<4x32xf32>
    %641 = arith.addf %392, %318 : vector<4x32xf32>
    %642 = arith.addf %470, %240 : vector<4x32xf32>
    %643 = arith.addf %548, %162 : vector<4x32xf32>
    %644 = arith.addf %626, %84 : vector<4x32xf32>
    %645 = vector.shape_cast %637 : vector<4x32xf32> to vector<1x4x32xf32>
    %646 = vector.shape_cast %638 : vector<4x32xf32> to vector<1x4x32xf32>
    %647 = vector.shape_cast %639 : vector<4x32xf32> to vector<1x4x32xf32>
    %648 = vector.shape_cast %640 : vector<4x32xf32> to vector<1x4x32xf32>
    %649 = vector.shape_cast %641 : vector<4x32xf32> to vector<1x4x32xf32>
    %650 = vector.shape_cast %642 : vector<4x32xf32> to vector<1x4x32xf32>
    %651 = vector.shape_cast %643 : vector<4x32xf32> to vector<1x4x32xf32>
    %652 = vector.shape_cast %644 : vector<4x32xf32> to vector<1x4x32xf32>
    %653 = tpu.concatenate %645, %646, %647, %648, %649, %650, %651, %652 in 0 : vector<1x4x32xf32>, vector<1x4x32xf32>, vector<1x4x32xf32>, vector<1x4x32xf32>, vector<1x4x32xf32>, vector<1x4x32xf32>, vector<1x4x32xf32>, vector<1x4x32xf32> -> vector<8x4x32xf32>
    %c0_105 = arith.constant 0 : index
    %c0_106 = arith.constant 0 : index
    %c0_107 = arith.constant 0 : index
    %654 = vector.load %arg9[%c0_105, %c0_106, %c0_107] : memref<8x4x32xf32, #tpu.memory_space<vmem>>, vector<8x4x32xf32>
    tpu.vector_store %arg9[%c0_105, %c0_106, %c0_107], %653 {strides = array<i32>} : memref<8x4x32xf32, #tpu.memory_space<vmem>>, vector<8x4x32xf32>,
    %c0_108 = arith.constant 0 : index
    %c0_109 = arith.constant 0 : index
    %c0_110 = arith.constant 0 : index
    %655 = vector.load %arg10[%c0_108, %c0_109, %c0_110] : memref<2x4x32xf32, #tpu.memory_space<vmem>>, vector<1x4x32xf32>
    %656 = vector.shape_cast %655 : vector<1x4x32xf32> to vector<4x32xf32>
    %657 = vector.shape_cast %633 : vector<4x32xf32> to vector<1x4x32xf32>
    tpu.vector_store %arg10[%c0_108, %c0_109, %c0_110], %657 {strides = array<i32>} : memref<2x4x32xf32, #tpu.memory_space<vmem>>, vector<1x4x32xf32>,
    %c1 = arith.constant 1 : index
    %c0_111 = arith.constant 0 : index
    %c0_112 = arith.constant 0 : index
    %658 = vector.load %arg10[%c1, %c0_111, %c0_112] : memref<2x4x32xf32, #tpu.memory_space<vmem>>, vector<1x4x32xf32>
    %659 = vector.shape_cast %658 : vector<1x4x32xf32> to vector<4x32xf32>
    %660 = vector.shape_cast %636 : vector<4x32xf32> to vector<1x4x32xf32>
    tpu.vector_store %arg10[%c1, %c0_111, %c0_112], %660 {strides = array<i32>} : memref<2x4x32xf32, #tpu.memory_space<vmem>>, vector<1x4x32xf32>,
    return
  }
  func.func @transform_0(%arg0: i32) -> (i32, i32) {
    %c0_i32 = arith.constant 0 : i32
    %c0_i32_0 = arith.constant 0 : i32
    %c0_i32_1 = arith.constant 0 : i32
    return %c0_i32, %c0_i32_0 : i32, i32
  }
  func.func @transform_1(%arg0: i32) -> (i32, i32) {
    %c0_i32 = arith.constant 0 : i32
    %c0_i32_0 = arith.constant 0 : i32
    %c0_i32_1 = arith.constant 0 : i32
    return %c0_i32, %c0_i32_0 : i32, i32
  }
  func.func @transform_2(%arg0: i32) -> (i32, i32) {
    %c0_i32 = arith.constant 0 : i32
    %c0_i32_0 = arith.constant 0 : i32
    %c0_i32_1 = arith.constant 0 : i32
    return %c0_i32, %c0_i32_0 : i32, i32
  }
  func.func @transform_3(%arg0: i32) -> (i32, i32) {
    %c0_i32 = arith.constant 0 : i32
    %c0_i32_0 = arith.constant 0 : i32
    %c0_i32_1 = arith.constant 0 : i32
    return %c0_i32, %c0_i32_0 : i32, i32
  }
  func.func @transform_4(%arg0: i32) -> (i32, i32) {
    %c0_i32 = arith.constant 0 : i32
    %c0_i32_0 = arith.constant 0 : i32
    %c0_i32_1 = arith.constant 0 : i32
    return %c0_i32, %c0_i32_0 : i32, i32
  }
  func.func @transform_5(%arg0: i32) -> (i32, i32) {
    %c0_i32 = arith.constant 0 : i32
    %c0_i32_0 = arith.constant 0 : i32
    %c0_i32_1 = arith.constant 0 : i32
    return %c0_i32, %c0_i32_0 : i32, i32
  }
  func.func @transform_6(%arg0: i32) -> (i32, i32) {
    %c0_i32 = arith.constant 0 : i32
    %c0_i32_0 = arith.constant 0 : i32
    %c0_i32_1 = arith.constant 0 : i32
    return %c0_i32, %c0_i32_0 : i32, i32
  }
  func.func @transform_7(%arg0: i32) -> (i32, i32) {
    %c0_i32 = arith.constant 0 : i32
    %c0_i32_0 = arith.constant 0 : i32
    %c0_i32_1 = arith.constant 0 : i32
    return %c0_i32, %c0_i32_0 : i32, i32
  }
  func.func @transform_8(%arg0: i32) -> (i32, i32, i32) {
    %c0_i32 = arith.constant 0 : i32
    %c0_i32_0 = arith.constant 0 : i32
    %c0_i32_1 = arith.constant 0 : i32
    %c0_i32_2 = arith.constant 0 : i32
    return %c0_i32, %c0_i32_0, %c0_i32_1 : i32, i32, i32
  }
  func.func @transform_9(%arg0: i32) -> (i32, i32, i32) {
    %c0_i32 = arith.constant 0 : i32
    %c0_i32_0 = arith.constant 0 : i32
    %c0_i32_1 = arith.constant 0 : i32
    %c0_i32_2 = arith.constant 0 : i32
    return %c0_i32, %c0_i32_0, %c0_i32_1 : i32, i32, i32
  }
}

</mosaic_0001>

<bundles_post_ra>
// kernel: encoder_forward.1
= control target key start
LH: loop header
LB: loop body
LE: loop exit
PB: predicated region body
PF: predicated region fallthrough
CT: control target
= control target key end

     0   :  { %15 = vsyncpa [#allocation3], 0  ;;  %s2527_s0 = inlined_call_operand.vmem [shape: s32[4,1], index: 0, kind: input, shape index: {}]   ;;  %s2528_s1 = inlined_call_operand.vmem [shape: f32[32,32], index: 1, kind: input, shape index: {}]   ;;  %s2529_s2 = inlined_call_operand.vmem [shape: f32[32,192], index: 2, kind: input, shape index: {}]   ;;  %s2530_s3 = inlined_call_operand.vmem [shape: f32[1,192], index: 3, kind: input, shape index: {}]   ;;  %s2531_s4 = inlined_call_operand.vmem [shape: f32[32,96], index: 4, kind: input, shape index: {}]   ;;  %s2532_s5 = inlined_call_operand.vmem [shape: f32[32,96], index: 5, kind: input, shape index: {}]   ;;  %s2533_s6 = inlined_call_operand.vmem [shape: f32[1,32], index: 6, kind: input, shape index: {}]   ;;  %s2534_s7 = inlined_call_operand.vmem [shape: f32[1,32], index: 7, kind: input, shape index: {}]   ;;  %s2535_s8 = inlined_call_operand.hbm [shape: f32[8,4,32], index: 8, kind: output, shape index: {0}]   ;;  %s2536_s9 = inlined_call_operand.hbm [shape: f32[2,4,32], index: 9, kind: output, shape index: {1}]  }
   0x1   :  { %v1920_v0 = vld [vmem:[%s2531_s4 + $0x18] sm:$0xff]  ;;  %v1925_v1 = vld [vmem:[%s2531_s4 + $0x10] sm:$0xff]  ;;  %v42_v3 = vld [vmem:[%s2529_s2 + $0x20] sm:$0xff] }
   0x2   :  { %v44_v2 = vld [vmem:[%s2529_s2 + $0x30] sm:$0xff]  ;;  %148 = vmatpush.msra.mxu2 %v1920_v0  ;;  %v1937_v4 = vld [vmem:[%s2531_s4 + $0x8] sm:$0xff]  ;;  %v1946_v6 = vld [vmem:[%s2531_s4] sm:$0xff] }
   0x3   :  { %77 = vmatpush.msra.mxu0 %v44_v2  ;;  %v40_v5 = vld [vmem:[%s2529_s2 + $0x10] sm:$0xff]  ;;  %v1677_v7 = vld [vmem:[%s2533_s6] ss:$0 sm:$0xff] }
   0x4   :  { %149 = vmatpush.msra.mxu2 %v1925_v1  ;;  %v38_v8 = vld [vmem:[%s2529_s2] sm:$0xff] }
   0x5   :  { %78 = vmatpush.msra.mxu0 %v42_v3 }
   0x6   :  { %16 = vsyncpa [#allocation5], 0  ;;  %150 = vmatpush.msra.mxu2 %v1937_v4  ;;  %v1958_v9 = vld [vmem:[%s2528_s1] sm:$0xff]  ;;  %vm52_vm0 = vcmask 261120   ;;  %s1859_s4 = smov 64   ;;  %v1860_v10 = vmov 0.0  }
   0x7   :  { %79 = vmatpush.msra.mxu0 %v40_v5  ;;  %198 = vrot.lane.b32.xlu0 %v1677_v7, %s1859_s4  ;;  %v1983_v11 = vld [vmem:[%s2532_s5 + $0x18] sm:$0xff]  ;;  %v1988_v12 = vld [vmem:[%s2532_s5 + $0x10] sm:$0xff]  ;;  %v1994_v13 = vld [vmem:[%s2532_s5 + $0x8] sm:$0xff]  ;;  %v1861_v30 = vmov 0   ;;  %s1862_s29 = smov 96   ;;  %s1864_s30 = smov [#allocation4]  }
   0x8   :  { %151 = vmatpush.msra.mxu2 %v1946_v6  ;;  %168 = vmatpush.msra.mxu3 %v1983_v11  ;;  %v2000_v14 = vld [vmem:[%s2532_s5] sm:$0xff]  ;;  %v45_v27 = vld [vmem:[%s2529_s2 + $0x38] sm:$0xff]  ;;  %v43_v28 = vld [vmem:[%s2529_s2 + $0x28] sm:$0xff]  ;;  %s1602_s10 = sshll.u32 %s1864_s30, 4  ;;  %s1604_s13 = sshll.u32 %s2536_s9, 4  ;;  %s1603_s10 = int_to_ptr.vmem [resolvable:$true] %s1602_s10  ;;  %s1605_s13 = int_to_ptr.hbm [resolvable:$true] %s1604_s13 }
   0x9   :  { %80 = vmatpush.msra.mxu0 %v38_v8  ;;  %152 = vmatmul.f32.vlgmr.msra.gmra.mxu2 %v1860_v10  ;;  %v2019_v18 = vld [vmem:[%s2530_s3] sm:$0x3]  ;;  %v35_v29 = vld [vmem:[%s2528_s1 + $0x8] sm:$0xff]  ;;  %v41_v32 = vld [vmem:[%s2529_s2 + $0x18] sm:$0xff]  ;;  %s1865_s14 = smov 4   ;;  %s1866_s9 = smov [#allocation2]  }
   0xa   :  { %1621 = vmatmul.msk.f32.vlgmr.msra.gmra.mxu0 %vm52_vm0, %v1958_v9  ;;  %326 = vmatpush.msrb.mxu2 %v1920_v0  ;;  %v2022_v19 = vperm.slane %v2019_v18, 0  ;;  %v2045_v33 = vld [vmem:[%s2527_s0] sm:$0xf]  ;;  %v39_v34 = vld [vmem:[%s2529_s2 + $0x8] sm:$0xff]  ;;  %v36_v37 = vld [vmem:[%s2528_s1 + $0x10] sm:$0xff]  ;;  %v49_v52 = vperm.slane %v2019_v18, 1 }
   0xb   :  { %860 = vmatpush.msrb.mxu0 %v1920_v0  ;;  %169 = vmatpush.msra.mxu3 %v1988_v12  ;;  %vm292_vm1 = vcmp.gt.s32.totalorder %v2045_v33, 0  ;;  %vm293_vm2 = vcmp.gt.s32.totalorder %v2045_v33, 7  ;;  %v37_v42 = vld [vmem:[%s2528_s1 + $0x18] sm:$0xff]  ;;  %v1678_v51 = vld [vmem:[%s2534_s7] ss:$0 sm:$0xff]  ;;  %s1863_s7 = smov 32  }
   0xc   :  { %327 = vmatpush.msrb.mxu2 %v1925_v1  ;;  %106 = vmatpush.msra.mxu1 %v45_v27  ;;  %v294_v35 = vsel %vm292_vm1, 1, %v1861_v30  ;;  %v300_v39 = vsel %vm293_vm2, 1, %v1861_v30  ;;  %s1589_s5 = sshll.u32 %s1866_s9, 4  ;;  %s1591_s17 = sshll.u32 %s2535_s8, 4  ;;  %s1590_s5 = int_to_ptr.vmem [resolvable:$true] %s1589_s5  ;;  %s1592_s17 = int_to_ptr.hbm [resolvable:$true] %s1591_s17 }
   0xd   :  { %861 = vmatpush.msrb.mxu0 %v1925_v1  ;;  %170 = vmatpush.msra.mxu3 %v1994_v13 }
   0xe   :  { %328 = vmatpush.msrb.mxu2 %v1937_v4  ;;  %1675 = vset.pattern.permute.xlu0 %v1861_v30 }
   0xf   :  { %862 = vmatpush.msrb.mxu0 %v1937_v4  ;;  %171 = vmatpush.msra.mxu3 %v2000_v14 }
  0x10   :  { %329 = vmatpush.msrb.mxu2 %v1946_v6  ;;  %172 = vmatmul.f32.vlgmr.msra.gmra.mxu3 %v1860_v10 }
  0x11   :  { %863 = vmatpush.msrb.mxu0 %v1946_v6  ;;  %349 = vmatpush.msrb.mxu3 %v1983_v11 }
  0x12   :  { %504 = vmatpush.msra.mxu2 %v1920_v0  ;;  %1622 = vmatmul.msk.f32.gmra.mxu0 %vm52_vm0, %v35_v29 }
  0x13   :  { %1192 = vmatpush.msra.mxu0 %v1920_v0  ;;  %350 = vmatpush.msrb.mxu3 %v1988_v12 }
  0x14   :  { %505 = vmatpush.msra.mxu2 %v1925_v1  ;;  %1676 = vset.pattern.permute.xlu1 %v1861_v30 }
  0x15   :  { %1193 = vmatpush.msra.mxu0 %v1925_v1  ;;  %351 = vmatpush.msrb.mxu3 %v1994_v13 }
  0x16   :  { %506 = vmatpush.msra.mxu2 %v1937_v4  ;;  %107 = vmatpush.msra.mxu1 %v43_v28 }
  0x17   :  { %1194 = vmatpush.msra.mxu0 %v1937_v4  ;;  %352 = vmatpush.msrb.mxu3 %v2000_v14 }
  0x18   :  { %507 = vmatpush.msra.mxu2 %v1946_v6  ;;  %108 = vmatpush.msra.mxu1 %v41_v32 }
  0x19   :  { %1195 = vmatpush.msra.mxu0 %v1946_v6  ;;  %527 = vmatpush.msra.mxu3 %v1983_v11 }
  0x1a   :  { %109 = vmatpush.msra.mxu1 %v39_v34  ;;  %1623 = vmatmul.msk.f32.gmra.mxu0 %vm52_vm0, %v36_v37 }
  0x1b   :  { %528 = vmatpush.msra.mxu3 %v1988_v12  ;;  %1625 = vmatmul.msk.f32.vlgmr.msra.gmra.mxu1 %vm52_vm0, %v1958_v9 }
  0x1c   :  { %883 = vmatpush.msrb.mxu1 %v1983_v11 }
  0x1d   :  { %529 = vmatpush.msra.mxu3 %v1994_v13 }
  0x1e   :  { %884 = vmatpush.msrb.mxu1 %v1988_v12 }
  0x1f   :  { %530 = vmatpush.msra.mxu3 %v2000_v14 }
  0x20   :  { %885 = vmatpush.msrb.mxu1 %v1994_v13 }
  0x22   :  { %886 = vmatpush.msrb.mxu1 %v2000_v14  ;;  %1624 = vmatmul.msk.f32.gmra.mxu0 %vm52_vm0, %v37_v42 }
  0x23   :  { %1626 = vmatmul.msk.f32.gmra.mxu1 %vm52_vm0, %v35_v29 }
  0x24   :  { %1215 = vmatpush.msra.mxu1 %v1983_v11 }
  0x26   :  { %1216 = vmatpush.msra.mxu1 %v1988_v12 }
  0x28   :  { %1217 = vmatpush.msra.mxu1 %v1994_v13 }
  0x2a   :  { %1218 = vmatpush.msra.mxu1 %v2000_v14 }
  0x2b   :  { %1627 = vmatmul.msk.f32.gmra.mxu1 %vm52_vm0, %v36_v37 }
  0x33   :  { %1628 = vmatmul.msk.f32.gmra.mxu1 %vm52_vm0, %v37_v42 }
  0x79   :  { %v2008_v15 = vpop.permute.xlu0 %198 }
  0x87   :  { %v82_v20 = vpop.f32.mrf.mxu0 }
  0x88   :  { %v2025_v21 = vadd.f32 %v82_v20, %v2022_v19 }
  0x8c   :  { %v153_v16 = vpop.f32.mrf.mxu2 }
  0x8d   :  { %v201_v17 = vadd.f32 %v2008_v15, %v153_v16  ;;  %v176_v22 = vadd.f32 %v153_v16, %v2025_v21 }
  0x8f   :  { %203 = vrot.lane.b32.xlu0 %v201_v17, %s1859_s4  ;;  %v1629_v23 = vmul.f32 -1.442695, %v176_v22  ;;  %v2095_v3 = vpop.f32.mrf.mxu0 }
  0x91   :  { %1679 = vpow2.f32 %v1629_v23 }
  0x93   :  { %v173_v49 = vpop.f32.mrf.mxu3 }
  0x94   :  { %v222_v50 = vrot.slane %v173_v49, 4 }
  0x96   :  { %223 = vrot.lane.b32.xlu2 %v222_v50, %s1862_s29 }
  0x97   :  { %v1680_v24 = vpop.eup %1679  ;;  %296 = vperm.xlu0 %1675, %v294_v35   ;;  %v2097_v5 = vpop.f32.mrf.mxu0 }
  0x98   :  { %v180_v25 = vadd.f32 1.0, %v1680_v24  ;;  %v111_v53 = vpop.f32.mrf.mxu1 }
  0x99   :  { %v2083_v54 = vadd.f32 %v111_v53, %v49_v52 }
  0x9a   :  { %1681 = vrcp.f32 %v180_v25  ;;  %v192_v41 = vand.u32 2147483648, %v180_v25  ;;  %vm186_vm4 = vweird.f32 %v180_v25  ;;  %v190_v43 = vand.u32 2147483647, %v180_v25 }
  0x9c   :  { %v193_v45 = vor.u32 1.1754944e-38, %v192_v41  ;;  %vm191_vm6 = vcmp.eq.f32.partialorder %v190_v43, 8.507059e+37 }
  0x9f   :  { %302 = vperm.xlu0 %1675, %v300_v39   ;;  %v91_v7 = vpop.f32.mrf.mxu0 }
  0xa0   :  { %v1682_v26 = vpop.eup %1681  ;;  %v114_v57 = vpop.f32.mrf.mxu1  ;;  %v2100_v8 = vadd.f32 %v91_v7, %v2022_v19 }
  0xa1   :  { %v182_v31 = vmul.f32 %v1682_v26, %v180_v25  ;;  %vm187_vm3 = vweird.f32 %v1682_v26  ;;  %v2086_v58 = vadd.f32 %v114_v57, %v49_v52 }
  0xa2   :  { %vm188_vm5 = vmor %vm186_vm4, %vm187_vm3 }
  0xa3   :  { %v183_v36 = vsub.f32 1.0, %v182_v31 }
  0xa5   :  { %v184_v38 = vmul.f32 %v1682_v26, %v183_v36 }
  0xa7   :  { %v185_v40 = vadd.f32 %v1682_v26, %v184_v38 }
  0xa8   :  { %v117_v63 = vpop.f32.mrf.mxu1 }
  0xa9   :  { %v189_v44 = vsel %vm188_vm5, %v1682_v26, %v185_v40  ;;  %v2092_v2 = vadd.f32 %v117_v63, %v49_v52 }
  0xaa   :  { %v194_v47 = vsel %vm191_vm6, %v193_v45, %v189_v44  ;;  %vm467_vm6 = vcmp.gt.s32.totalorder %v2045_v33, 1 }
  0xab   :  { %v213_v20 = vsub.f32 1.0, %v194_v47  ;;  %v219_v24 = vmul.f32 0.0, %v194_v47 }
  0xb0   :  { %v120_v43 = vpop.f32.mrf.mxu1 }
  0xb1   :  { %v2121_v44 = vadd.f32 %v120_v43, %v49_v52 }
  0xf0   :  { %v224_v9 = vpop.permute.xlu2 %223 }
  0xf1   :  { %v226_v10 = vadd.f32 %v224_v9, %v2100_v8 }
  0xf3   :  { %v1630_v16 = vmul.f32 -1.442695, %v226_v10 }
 0x101   :  { %v204_v46 = vpop.permute.xlu0 %203 }
 0x102   :  { %v206_v48 = vmul.f32 %v204_v46, %v194_v47 }
 0x104   :  { %208 = vrot.lane.b32.xlu1 %v206_v48, %s1859_s4  ;;  %v246_v48 = vadd.f32 %v224_v9, %v2121_v44 }
 0x109   :  { %v2103_v23 = vpop.permute.xlu0 %296 }
 0x10a   :  { %vm298_vm7 = vcmp.eq.s32.totalorder %v2103_v23, 1 }
 0x10c   :  { %268 = vrot.lane.b32.xlu1 %v1678_v51, %s1859_s4 }
 0x176   :  { %v209_v55 = vpop.permute.xlu1 %208 }
 0x177   :  { %v211_v56 = vadd.f32 %v209_v55, %v2025_v21 }
 0x179   :  { %1683 = vtanh.f32 %v211_v56 }
 0x17a   :  { %1685 = vpow2.f32 %v1630_v16 }
 0x17e   :  { %v2088_v59 = vpop.permute.xlu1 %268 }
 0x17f   :  { %v1684_v60 = vpop.eup %1683  ;;  %v271_v61 = vadd.f32 %v2088_v59, %v173_v49  ;;  %v1631_v49 = vmul.f32 -1.442695, %v246_v48 }
 0x180   :  { %215 = vrot.lane.b32.xlu2 %v1684_v60, %s1862_s29  ;;  %v1686_v17 = vpop.eup %1685 }
 0x181   :  { %v273_v62 = vrot.slane %v271_v61, 4  ;;  %v230_v18 = vadd.f32 1.0, %v1686_v17 }
 0x183   :  { %274 = vrot.lane.b32.xlu1 %v273_v62, %s1863_s7  ;;  %1687 = vrcp.f32 %v230_v18  ;;  %vm236_vm8 = vweird.f32 %v230_v18  ;;  %v242_v34 = vand.u32 2147483648, %v230_v18  ;;  %v240_v36 = vand.u32 2147483647, %v230_v18 }
 0x185   :  { %v243_v37 = vor.u32 1.1754944e-38, %v242_v34  ;;  %vm241_vm11 = vcmp.eq.f32.partialorder %v240_v36, 8.507059e+37 }
 0x189   :  { %v1688_v27 = vpop.eup %1687 }
 0x18a   :  { %v232_v29 = vmul.f32 %v1688_v27, %v230_v18  ;;  %vm237_vm9 = vweird.f32 %v1688_v27 }
 0x18b   :  { %vm238_vm10 = vmor %vm236_vm8, %vm237_vm9 }
 0x18c   :  { %v233_v31 = vsub.f32 1.0, %v232_v29 }
 0x18e   :  { %v234_v32 = vmul.f32 %v1688_v27, %v233_v31 }
 0x190   :  { %v235_v35 = vadd.f32 %v1688_v27, %v234_v32 }
 0x192   :  { %v239_v38 = vsel %vm238_vm10, %v1688_v27, %v235_v35 }
 0x193   :  { %v244_v39 = vsel %vm241_vm11, %v243_v37, %v239_v38 }
 0x1da   :  { %v216_v22 = vpop.permute.xlu2 %215 }
 0x1db   :  { %v218_v25 = vmul.f32 %v216_v22, %v213_v20 }
 0x1dd   :  { %v220_v26 = vadd.f32 %v219_v24, %v218_v25  ;;  %v2128_v24 = vpop.permute.xlu0 %302 }
 0x1de   :  { %vm2537_vm1 = vcmp.eq.s32.totalorder %v2128_v24, 1 }
 0x1df   :  { %v2108_v28 = vsel %vm298_vm7, %v220_v26, 0.0 }
 0x1e0   :  { %310 = vrot.lane.b32.xlu2 %v2108_v28, %s1862_s29 }
 0x1f5   :  { %v275_v40 = vpop.permute.xlu1 %274 }
 0x1f6   :  { %v277_v41 = vmul.f32 %v275_v40, %v244_v39 }
 0x1f8   :  { %279 = vrot.lane.b32.xlu1 %v277_v41, %s1859_s4 }
 0x23a   :  { %v2113_v42 = vpop.permute.xlu2 %310 }
 0x23b   :  { %1632 = vmatmul.msk.f32.vlgmr.msrb.gmra.mxu2 %vm52_vm0, %v2113_v42 }
 0x23c   :  { %682 = vmatpush.msrb.mxu2 %v1920_v0 }
 0x23e   :  { %683 = vmatpush.msrb.mxu2 %v1925_v1 }
 0x240   :  { %684 = vmatpush.msrb.mxu2 %v1937_v4 }
 0x242   :  { %685 = vmatpush.msrb.mxu2 %v1946_v6 }
 0x26a   :  { %v280_v45 = vpop.permute.xlu1 %279 }
 0x26b   :  { %v282_v46 = vadd.f32 %v280_v45, %v2121_v44 }
 0x26d   :  { %1689 = vtanh.f32 %v282_v46 }
 0x26e   :  { %1691 = vpow2.f32 %v1631_v49 }
 0x273   :  { %v1690_v47 = vpop.eup %1689 }
 0x274   :  { %286 = vrot.lane.b32.xlu2 %v1690_v47, %s1862_s29  ;;  %v1692_v50 = vpop.eup %1691 }
 0x275   :  { %v250_v51 = vadd.f32 1.0, %v1692_v50 }
 0x277   :  { %1693 = vrcp.f32 %v250_v51  ;;  %vm256_vm12 = vweird.f32 %v250_v51  ;;  %v262_v62 = vand.u32 2147483648, %v250_v51  ;;  %v260_v7 = vand.u32 2147483647, %v250_v51 }
 0x279   :  { %v263_v9 = vor.u32 1.1754944e-38, %v262_v62  ;;  %vm261_vm15 = vcmp.eq.f32.partialorder %v260_v7, 8.507059e+37 }
 0x27d   :  { %v1694_v53 = vpop.eup %1693 }
 0x27e   :  { %v252_v55 = vmul.f32 %v1694_v53, %v250_v51  ;;  %vm257_vm13 = vweird.f32 %v1694_v53 }
 0x27f   :  { %vm258_vm14 = vmor %vm256_vm12, %vm257_vm13  ;;  %vm468_vm12 = vcmp.gt.s32.totalorder %v2045_v33, 6 }
 0x280   :  { %v253_v56 = vsub.f32 1.0, %v252_v55 }
 0x282   :  { %v254_v60 = vmul.f32 %v1694_v53, %v253_v56 }
 0x284   :  { %v255_v63 = vadd.f32 %v1694_v53, %v254_v60 }
 0x286   :  { %v259_v10 = vsel %vm258_vm14, %v1694_v53, %v255_v63  ;;  %v469_v53 = vsel %vm467_vm6, 1, %v1861_v30 }
 0x287   :  { %v264_v16 = vsel %vm261_vm15, %v263_v9, %v259_v10 }
 0x288   :  { %v284_v17 = vsub.f32 1.0, %v264_v16  ;;  %v290_v20 = vmul.f32 0.0, %v264_v16 }
 0x2be   :  { %v331_v57 = vpop.f32.mrf.mxu2 }
 0x2bf   :  { %v380_v52 = vadd.f32 %v331_v57, %v2008_v15  ;;  %v358_v29 = vrot.slane %v331_v57, 4 }
 0x2c1   :  { %v382_v61 = vrot.slane %v380_v52, 4  ;;  %v360_v31 = vadd.f32 %v358_v29, %v2025_v21 }
 0x2c3   :  { %383 = vrot.lane.b32.xlu1 %v382_v61, %s1859_s4  ;;  %v1634_v32 = vmul.f32 -1.442695, %v360_v31 }
 0x2c5   :  { %1695 = vpow2.f32 %v1634_v32  ;;  %v399_v32 = vrot.slane %v2108_v28, 4 }
 0x2cb   :  { %v1696_v34 = vpop.eup %1695 }
 0x2cc   :  { %v364_v35 = vadd.f32 1.0, %v1696_v34 }
 0x2ce   :  { %v287_v18 = vpop.permute.xlu2 %286  ;;  %1697 = vrcp.f32 %v364_v35  ;;  %v376_v41 = vand.u32 2147483648, %v364_v35  ;;  %vm370_vm3 = vweird.f32 %v364_v35  ;;  %v374_v43 = vand.u32 2147483647, %v364_v35 }
 0x2cf   :  { %v289_v22 = vmul.f32 %v287_v18, %v284_v17 }
 0x2d0   :  { %v377_v46 = vor.u32 1.1754944e-38, %v376_v41  ;;  %vm375_vm5 = vcmp.eq.f32.partialorder %v374_v43, 8.507059e+37 }
 0x2d1   :  { %v291_v25 = vadd.f32 %v290_v20, %v289_v22 }
 0x2d3   :  { %v306_v26 = vrot.slane %v291_v25, 4 }
 0x2d4   :  { %v1698_v36 = vpop.eup %1697 }
 0x2d5   :  { %v2133_v27 = vsel %vm2537_vm1, %v306_v26, 0.0  ;;  %v366_v37 = vmul.f32 %v1698_v36, %v364_v35  ;;  %vm371_vm2 = vweird.f32 %v1698_v36 }
 0x2d6   :  { %1633 = vmatmul.msk.f32.vlgmr.msrb.gmra.mxu3 %vm52_vm0, %v2133_v27  ;;  %vm372_vm4 = vmor %vm370_vm3, %vm371_vm2 }
 0x2d7   :  { %705 = vmatpush.msrb.mxu3 %v1983_v11  ;;  %v367_v38 = vsub.f32 1.0, %v366_v37 }
 0x2d9   :  { %706 = vmatpush.msrb.mxu3 %v1988_v12  ;;  %v368_v39 = vmul.f32 %v1698_v36, %v367_v38 }
 0x2db   :  { %707 = vmatpush.msrb.mxu3 %v1994_v13  ;;  %v369_v40 = vadd.f32 %v1698_v36, %v368_v39 }
 0x2dd   :  { %708 = vmatpush.msrb.mxu3 %v2000_v14  ;;  %v373_v45 = vsel %vm372_vm4, %v1698_v36, %v369_v40  ;;  %v480_v40 = vsel %vm468_vm12, 1, %v1861_v30 }
 0x2de   :  { %v378_v48 = vsel %vm375_vm5, %v377_v46, %v373_v45  ;;  %vm646_vm5 = vcmp.gt.s32.totalorder %v2045_v33, 2 }
 0x2df   :  { %v393_v34 = vsub.f32 1.0, %v378_v48  ;;  %v401_v37 = vmul.f32 %v399_v32, %v378_v48 }
 0x335   :  { %v384_v47 = vpop.permute.xlu1 %383 }
 0x336   :  { %v386_v49 = vmul.f32 %v384_v47, %v378_v48 }
 0x338   :  { %388 = vrot.lane.b32.xlu2 %v386_v49, %s1859_s4 }
 0x359   :  { %v354_v50 = vpop.f32.mrf.mxu3 }
 0x35a   :  { %v447_v51 = vadd.f32 %v354_v50, %v2088_v59  ;;  %404 = vrot.lane.b32.xlu0 %v354_v50, %s1862_s29 }
 0x35c   :  { %449 = vrot.lane.b32.xlu2 %v447_v51, %s1863_s7 }
 0x362   :  { %471 = vperm.xlu0 %1675, %v469_v53  }
 0x392   :  { %v389_v55 = vpop.permute.xlu2 %388 }
 0x393   :  { %v391_v56 = vadd.f32 %v389_v55, %v2025_v21 }
 0x395   :  { %1699 = vtanh.f32 %v391_v56 }
 0x39b   :  { %v1700_v57 = vpop.eup %1699 }
 0x39c   :  { %395 = vrot.lane.b32.xlu1 %v1700_v57, %s1862_s29 }
 0x3b6   :  { %v450_v26 = vpop.permute.xlu2 %449 }
 0x3cc   :  { %v405_v52 = vpop.permute.xlu0 %404 }
 0x3cd   :  { %v407_v60 = vadd.f32 %v405_v52, %v2100_v8  ;;  %v427_v49 = vadd.f32 %v405_v52, %v2121_v44 }
 0x3cf   :  { %v1635_v61 = vmul.f32 -1.442695, %v407_v60  ;;  %v1636_v50 = vmul.f32 -1.442695, %v427_v49 }
 0x3d1   :  { %1701 = vpow2.f32 %v1635_v61 }
 0x3d4   :  { %v2158_v46 = vpop.permute.xlu0 %471 }
 0x3d5   :  { %vm473_vm13 = vcmp.eq.s32.totalorder %v2158_v46, 1 }
 0x3d7   :  { %v1702_v62 = vpop.eup %1701 }
 0x3d8   :  { %v411_v63 = vadd.f32 1.0, %v1702_v62 }
 0x3da   :  { %1703 = vrcp.f32 %v411_v63  ;;  %v423_v16 = vand.u32 2147483648, %v411_v63  ;;  %v421_v18 = vand.u32 2147483647, %v411_v63  ;;  %vm417_vm9 = vweird.f32 %v411_v63 }
 0x3dc   :  { %v424_v22 = vor.u32 1.1754944e-38, %v423_v16  ;;  %vm422_vm11 = vcmp.eq.f32.partialorder %v421_v18, 8.507059e+37 }
 0x3e0   :  { %v1704_v7 = vpop.eup %1703 }
 0x3e1   :  { %v413_v9 = vmul.f32 %v1704_v7, %v411_v63  ;;  %vm418_vm8 = vweird.f32 %v1704_v7 }
 0x3e2   :  { %vm419_vm10 = vmor %vm417_vm9, %vm418_vm8 }
 0x3e3   :  { %v414_v10 = vsub.f32 1.0, %v413_v9 }
 0x3e5   :  { %v415_v17 = vmul.f32 %v1704_v7, %v414_v10 }
 0x3e7   :  { %v416_v20 = vadd.f32 %v1704_v7, %v415_v17 }
 0x3e9   :  { %v420_v25 = vsel %vm419_vm10, %v1704_v7, %v416_v20 }
 0x3ea   :  { %v425_v29 = vsel %vm422_vm11, %v424_v22, %v420_v25 }
 0x3eb   :  { %v452_v31 = vmul.f32 %v450_v26, %v425_v29  ;;  %v2198_v26 = vadd.f32 %v2095_v3, %v2022_v19 }
 0x3ed   :  { %454 = vrot.lane.b32.xlu2 %v452_v31, %s1859_s4 }
 0x40e   :  { %v396_v35 = vpop.permute.xlu1 %395 }
 0x40f   :  { %v398_v36 = vmul.f32 %v396_v35, %v393_v34 }
 0x411   :  { %v402_v38 = vadd.f32 %v401_v37, %v398_v36 }
 0x413   :  { %v475_v39 = vrot.slane %v402_v38, 4  ;;  %v648_v38 = vsel %vm646_vm5, 1, %v1861_v30 }
 0x415   :  { %476 = vrot.lane.b32.xlu1 %v475_v39, %s1862_s29 }
 0x41d   :  { %482 = vperm.xlu1 %1676, %v480_v40  }
 0x447   :  { %v455_v41 = vpop.permute.xlu2 %454 }
 0x448   :  { %v457_v43 = vadd.f32 %v455_v41, %v2121_v44 }
 0x44a   :  { %1705 = vtanh.f32 %v457_v43 }
 0x44b   :  { %1707 = vpow2.f32 %v1636_v50 }
 0x450   :  { %v1706_v45 = vpop.eup %1705 }
 0x451   :  { %461 = vrot.lane.b32.xlu0 %v1706_v45, %s1862_s29  ;;  %v1708_v51 = vpop.eup %1707 }
 0x452   :  { %v431_v53 = vadd.f32 1.0, %v1708_v51 }
 0x454   :  { %1709 = vrcp.f32 %v431_v53  ;;  %v443_v61 = vand.u32 2147483648, %v431_v53  ;;  %vm437_vm15 = vweird.f32 %v431_v53  ;;  %v441_v62 = vand.u32 2147483647, %v431_v53 }
 0x456   :  { %v444_v52 = vor.u32 1.1754944e-38, %v443_v61  ;;  %vm442_vm3 = vcmp.eq.f32.partialorder %v441_v62, 8.507059e+37 }
 0x487   :  { %v2161_v47 = vpop.permute.xlu1 %476 }
 0x488   :  { %v2167_v48 = vsel %vm473_vm13, %v2161_v47, %v2113_v42  ;;  %v1710_v42 = vpop.eup %1709 }
 0x489   :  { %1637 = vmatmul.msk.f32.vlgmr.msra.gmra.mxu2 %vm52_vm0, %v2167_v48  ;;  %v433_v55 = vmul.f32 %v1710_v42, %v431_v53  ;;  %vm438_vm14 = vweird.f32 %v1710_v42 }
 0x48a   :  { %1026 = vmatpush.msra.mxu2 %v1920_v0  ;;  %vm439_vm2 = vmor %vm437_vm15, %vm438_vm14 }
 0x48b   :  { %v434_v56 = vsub.f32 1.0, %v433_v55 }
 0x48c   :  { %1027 = vmatpush.msra.mxu2 %v1925_v1 }
 0x48d   :  { %v435_v57 = vmul.f32 %v1710_v42, %v434_v56 }
 0x48e   :  { %1028 = vmatpush.msra.mxu2 %v1937_v4 }
 0x48f   :  { %v436_v60 = vadd.f32 %v1710_v42, %v435_v57  ;;  %v2176_v9 = vpop.permute.xlu1 %482 }
 0x490   :  { %1029 = vmatpush.msra.mxu2 %v1946_v6  ;;  %vm484_vm4 = vcmp.eq.s32.totalorder %v2176_v9, 1 }
 0x491   :  { %v440_v44 = vsel %vm439_vm2, %v1710_v42, %v436_v60 }
 0x492   :  { %v445_v63 = vsel %vm442_vm3, %v444_v52, %v440_v44  ;;  %v2213_v44 = vadd.f32 %v2097_v5, %v2022_v19  ;;  %vm647_vm3 = vcmp.gt.s32.totalorder %v2045_v33, 5 }
 0x493   :  { %v459_v7 = vsub.f32 1.0, %v445_v63  ;;  %v465_v16 = vmul.f32 %v445_v63, %v2133_v27 }
 0x4c3   :  { %v462_v10 = vpop.permute.xlu0 %461 }
 0x4c4   :  { %v464_v17 = vmul.f32 %v462_v10, %v459_v7 }
 0x4c6   :  { %v2180_v18 = vadd.f32 %v465_v16, %v464_v17 }
 0x4c8   :  { %v2186_v20 = vsel %vm484_vm4, %v2180_v18, %v2133_v27 }
 0x4c9   :  { %1638 = vmatmul.msk.f32.vlgmr.msra.gmra.mxu3 %vm52_vm0, %v2186_v20 }
 0x4ca   :  { %1049 = vmatpush.msra.mxu3 %v1983_v11 }
 0x4cc   :  { %1050 = vmatpush.msra.mxu3 %v1988_v12 }
 0x4ce   :  { %1051 = vmatpush.msra.mxu3 %v1994_v13 }
 0x4d0   :  { %1052 = vmatpush.msra.mxu3 %v2000_v14 }
 0x50c   :  { %v509_v22 = vpop.f32.mrf.mxu2 }
 0x50d   :  { %v555_v25 = vadd.f32 %v509_v22, %v2008_v15  ;;  %v535_v29 = vadd.f32 %v509_v22, %v2198_v26 }
 0x50f   :  { %557 = vrot.lane.b32.xlu2 %v555_v25, %s1859_s4  ;;  %v1639_v31 = vmul.f32 -1.442695, %v535_v29 }
 0x511   :  { %1711 = vpow2.f32 %v1639_v31 }
 0x517   :  { %v1712_v32 = vpop.eup %1711 }
 0x518   :  { %v539_v34 = vadd.f32 1.0, %v1712_v32 }
 0x51a   :  { %1713 = vrcp.f32 %v539_v34  ;;  %v551_v43 = vand.u32 2147483648, %v539_v34  ;;  %vm545_vm8 = vweird.f32 %v539_v34  ;;  %v549_v45 = vand.u32 2147483647, %v539_v34 }
 0x51c   :  { %v552_v50 = vor.u32 1.1754944e-38, %v551_v43  ;;  %vm550_vm10 = vcmp.eq.f32.partialorder %v549_v45, 8.507059e+37  ;;  %v654_v45 = vsel %vm647_vm3, 1, %v1861_v30 }
 0x520   :  { %v1714_v37 = vpop.eup %1713 }
 0x521   :  { %v541_v39 = vmul.f32 %v1714_v37, %v539_v34  ;;  %vm546_vm6 = vweird.f32 %v1714_v37 }
 0x522   :  { %vm547_vm9 = vmor %vm545_vm8, %vm546_vm6 }
 0x523   :  { %v542_v3 = vsub.f32 1.0, %v541_v39 }
 0x525   :  { %v543_v40 = vmul.f32 %v1714_v37, %v542_v3 }
 0x527   :  { %v544_v41 = vadd.f32 %v1714_v37, %v543_v40 }
 0x529   :  { %v548_v49 = vsel %vm547_vm9, %v1714_v37, %v544_v41 }
 0x52a   :  { %v553_v51 = vsel %vm550_vm10, %v552_v50, %v548_v49 }
 0x52b   :  { %v567_v29 = vsub.f32 1.0, %v553_v51 }
 0x54c   :  { %v532_v35 = vpop.f32.mrf.mxu3 }
 0x54d   :  { %v579_v36 = vrot.slane %v532_v35, 4  ;;  %v623_v60 = vadd.f32 %v532_v35, %v2088_v59 }
 0x54f   :  { %580 = vrot.lane.b32.xlu1 %v579_v36, %s1862_s29  ;;  %v625_v61 = vrot.slane %v623_v60, 4 }
 0x557   :  { %650 = vperm.xlu1 %1676, %v648_v38  }
 0x569   :  { %v558_v53 = vpop.permute.xlu2 %557 }
 0x56a   :  { %v560_v42 = vmul.f32 %v558_v53, %v553_v51 }
 0x56c   :  { %562 = vrot.lane.b32.xlu0 %v560_v42, %s1859_s4 }
 0x574   :  { %573 = vrot.lane.b32.xlu0 %v2167_v48, %s1863_s7 }
 0x5c1   :  { %v581_v62 = vpop.permute.xlu1 %580 }
 0x5c2   :  { %v583_v52 = vadd.f32 %v581_v62, %v2213_v44  ;;  %v603_v42 = vadd.f32 %v581_v62, %v2092_v2 }
 0x5c4   :  { %v1640_v48 = vmul.f32 -1.442695, %v583_v52 }
 0x5c9   :  { %v2216_v32 = vpop.permute.xlu1 %650 }
 0x5ca   :  { %vm652_vm14 = vcmp.eq.s32.totalorder %v2216_v32, 1 }
 0x5de   :  { %v563_v55 = vpop.permute.xlu0 %562 }
 0x5df   :  { %v565_v56 = vadd.f32 %v563_v55, %v2198_v26  ;;  %v1641_v55 = vmul.f32 -1.442695, %v603_v42 }
 0x5e1   :  { %1715 = vtanh.f32 %v565_v56 }
 0x5e2   :  { %1717 = vpow2.f32 %v1640_v48 }
 0x5e6   :  { %v574_v25 = vpop.permute.xlu0 %573 }
 0x5e7   :  { %v1716_v57 = vpop.eup %1715  ;;  %v576_v34 = vmul.f32 %v574_v25, %v553_v51 }
 0x5e8   :  { %569 = vrot.lane.b32.xlu2 %v1716_v57, %s1862_s29  ;;  %v1718_v63 = vpop.eup %1717 }
 0x5e9   :  { %v587_v7 = vadd.f32 1.0, %v1718_v63 }
 0x5eb   :  { %1719 = vrcp.f32 %v587_v7  ;;  %v599_v5 = vand.u32 2147483648, %v587_v7  ;;  %vm593_vm12 = vweird.f32 %v587_v7  ;;  %v597_v37 = vand.u32 2147483647, %v587_v7 }
 0x5ed   :  { %v600_v3 = vor.u32 1.1754944e-38, %v599_v5  ;;  %vm598_vm2 = vcmp.eq.f32.partialorder %v597_v37, 8.507059e+37 }
 0x5f0   :  { %626 = vrot.lane.b32.xlu2 %v625_v61, %s1863_s7 }
 0x5f1   :  { %v1720_v10 = vpop.eup %1719 }
 0x5f2   :  { %v589_v16 = vmul.f32 %v1720_v10, %v587_v7  ;;  %vm594_vm11 = vweird.f32 %v1720_v10 }
 0x5f3   :  { %vm595_vm15 = vmor %vm593_vm12, %vm594_vm11 }
 0x5f4   :  { %v590_v17 = vsub.f32 1.0, %v589_v16 }
 0x5f6   :  { %v591_v22 = vmul.f32 %v1720_v10, %v590_v17 }
 0x5f8   :  { %v592_v19 = vadd.f32 %v1720_v10, %v591_v22 }
 0x5fa   :  { %v596_v39 = vsel %vm595_vm15, %v1720_v10, %v592_v19  ;;  %v642_v10 = vrot.slane %v2186_v20, 4 }
 0x5fb   :  { %v601_v40 = vsel %vm598_vm2, %v600_v3, %v596_v39  ;;  %vm823_vm2 = vcmp.gt.s32.totalorder %v2045_v33, 3 }
 0x642   :  { %v570_v31 = vpop.permute.xlu2 %569 }
 0x643   :  { %v572_v35 = vmul.f32 %v570_v31, %v567_v29 }
 0x645   :  { %v2218_v36 = vadd.f32 %v576_v34, %v572_v35 }
 0x647   :  { %v2224_v38 = vsel %vm652_vm14, %v2218_v36, %v574_v25 }
 0x648   :  { %666 = vrot.lane.b32.xlu0 %v2224_v38, %s1862_s29 }
 0x64a   :  { %v627_v41 = vpop.permute.xlu2 %626 }
 0x64b   :  { %v629_v43 = vmul.f32 %v627_v41, %v601_v40 }
 0x64d   :  { %631 = vrot.lane.b32.xlu1 %v629_v43, %s1859_s4 }
 0x650   :  { %656 = vperm.xlu0 %1675, %v654_v45  }
 0x6ba   :  { %v2231_v49 = vpop.permute.xlu0 %666 }
 0x6bb   :  { %1642 = vmatmul.msk.f32.vlgmr.msrb.gmra.mxu2 %vm52_vm0, %v2231_v49 }
 0x6bc   :  { %1358 = vmatpush.msrb.mxu2 %v1920_v0 }
 0x6be   :  { %1359 = vmatpush.msrb.mxu2 %v1925_v1 }
 0x6bf   :  { %v632_v50 = vpop.permute.xlu1 %631 }
 0x6c0   :  { %v634_v51 = vadd.f32 %v632_v50, %v2092_v2  ;;  %1360 = vmatpush.msrb.mxu2 %v1937_v4 }
 0x6c2   :  { %1721 = vtanh.f32 %v634_v51  ;;  %1361 = vmatpush.msrb.mxu2 %v1946_v6  ;;  %v2243_v25 = vpop.permute.xlu0 %656 }
 0x6c3   :  { %1723 = vpow2.f32 %v1641_v55  ;;  %vm658_vm10 = vcmp.eq.s32.totalorder %v2243_v25, 1 }
 0x6c8   :  { %v1722_v53 = vpop.eup %1721 }
 0x6c9   :  { %638 = vrot.lane.b32.xlu2 %v1722_v53, %s1862_s29  ;;  %v1724_v56 = vpop.eup %1723 }
 0x6ca   :  { %v607_v57 = vadd.f32 1.0, %v1724_v56 }
 0x6cc   :  { %1725 = vrcp.f32 %v607_v57  ;;  %v619_v4 = vand.u32 2147483648, %v607_v57  ;;  %vm613_vm6 = vweird.f32 %v607_v57  ;;  %v617_v48 = vand.u32 2147483647, %v607_v57 }
 0x6ce   :  { %v620_v63 = vor.u32 1.1754944e-38, %v619_v4  ;;  %vm618_vm9 = vcmp.eq.f32.partialorder %v617_v48, 8.507059e+37 }
 0x6d2   :  { %v1726_v0 = vpop.eup %1725 }
 0x6d3   :  { %v609_v1 = vmul.f32 %v1726_v0, %v607_v57  ;;  %vm614_vm5 = vweird.f32 %v1726_v0 }
 0x6d4   :  { %vm615_vm8 = vmor %vm613_vm6, %vm614_vm5  ;;  %vm824_vm5 = vcmp.gt.s32.totalorder %v2045_v33, 4 }
 0x6d5   :  { %v610_v60 = vsub.f32 1.0, %v609_v1  ;;  %v836_v1 = vsel %vm824_vm5, 1, %v1861_v30 }
 0x6d7   :  { %v611_v61 = vmul.f32 %v1726_v0, %v610_v60 }
 0x6d9   :  { %v612_v52 = vadd.f32 %v1726_v0, %v611_v61 }
 0x6db   :  { %v616_v6 = vsel %vm615_vm8, %v1726_v0, %v612_v52  ;;  %v825_v0 = vsel %vm823_vm2, 1, %v1861_v30 }
 0x6dc   :  { %v621_v7 = vsel %vm618_vm9, %v620_v63, %v616_v6 }
 0x6dd   :  { %v636_v62 = vsub.f32 1.0, %v621_v7  ;;  %v644_v17 = vmul.f32 %v642_v10, %v621_v7 }
 0x723   :  { %v639_v16 = vpop.permute.xlu2 %638 }
 0x724   :  { %v641_v22 = vmul.f32 %v639_v16, %v636_v62 }
 0x726   :  { %v2245_v29 = vadd.f32 %v644_v17, %v641_v22 }
 0x728   :  { %v660_v31 = vrot.slane %v2245_v29, 4 }
 0x72a   :  { %v2254_v34 = vsel %vm658_vm10, %v660_v31, %v2186_v20 }
 0x72b   :  { %1643 = vmatmul.msk.f32.vlgmr.msrb.gmra.mxu3 %vm52_vm0, %v2254_v34 }
 0x72c   :  { %1381 = vmatpush.msrb.mxu3 %v1983_v11 }
 0x72e   :  { %1382 = vmatpush.msrb.mxu3 %v1988_v12 }
 0x730   :  { %1383 = vmatpush.msrb.mxu3 %v1994_v13 }
 0x732   :  { %1384 = vmatpush.msrb.mxu3 %v2000_v14 }
 0x73e   :  { %v687_v35 = vpop.f32.mrf.mxu2 }
 0x73f   :  { %v736_v19 = vadd.f32 %v687_v35, %v2008_v15  ;;  %v714_v37 = vrot.slane %v687_v35, 4 }
 0x741   :  { %v738_v5 = vrot.slane %v736_v19, 4  ;;  %v716_v20 = vadd.f32 %v714_v37, %v2198_v26 }
 0x743   :  { %739 = vrot.lane.b32.xlu1 %v738_v5, %s1859_s4  ;;  %v1644_v39 = vmul.f32 -1.442695, %v716_v20 }
 0x745   :  { %1727 = vpow2.f32 %v1644_v39  ;;  %v755_v39 = vrot.slane %v2224_v38, 4 }
 0x74b   :  { %v1728_v3 = vpop.eup %1727 }
 0x74c   :  { %v720_v40 = vadd.f32 1.0, %v1728_v3 }
 0x74e   :  { %1729 = vrcp.f32 %v720_v40  ;;  %v732_v50 = vand.u32 2147483648, %v720_v40  ;;  %vm726_vm12 = vweird.f32 %v720_v40  ;;  %v730_v51 = vand.u32 2147483647, %v720_v40 }
 0x750   :  { %v733_v42 = vor.u32 1.1754944e-38, %v732_v50  ;;  %vm731_vm3 = vcmp.eq.f32.partialorder %v730_v51, 8.507059e+37 }
 0x754   :  { %v1730_v11 = vpop.eup %1729 }
 0x755   :  { %v722_v12 = vmul.f32 %v1730_v11, %v720_v40  ;;  %vm727_vm11 = vweird.f32 %v1730_v11 }
 0x756   :  { %vm728_vm15 = vmor %vm726_vm12, %vm727_vm11 }
 0x757   :  { %v723_v41 = vsub.f32 1.0, %v722_v12 }
 0x759   :  { %v724_v13 = vmul.f32 %v1730_v11, %v723_v41 }
 0x75b   :  { %v725_v14 = vadd.f32 %v1730_v11, %v724_v13 }
 0x75d   :  { %v729_v53 = vsel %vm728_vm15, %v1730_v11, %v725_v14 }
 0x75e   :  { %v734_v56 = vsel %vm731_vm3, %v733_v42, %v729_v53 }
 0x75f   :  { %v749_v3 = vsub.f32 1.0, %v734_v56  ;;  %v757_v12 = vmul.f32 %v755_v39, %v734_v56 }
 0x7ae   :  { %v710_v43 = vpop.f32.mrf.mxu3 }
 0x7af   :  { %v803_v45 = vadd.f32 %v710_v43, %v2088_v59  ;;  %760 = vrot.lane.b32.xlu0 %v710_v43, %s1862_s29 }
 0x7b1   :  { %805 = vrot.lane.b32.xlu1 %v803_v45, %s1863_s7 }
 0x7b5   :  { %v740_v55 = vpop.permute.xlu1 %739 }
 0x7b6   :  { %v742_v57 = vmul.f32 %v740_v55, %v734_v56 }
 0x7b8   :  { %744 = vrot.lane.b32.xlu2 %v742_v57, %s1859_s4 }
 0x7b9   :  { %827 = vperm.xlu1 %1676, %v825_v0  }
 0x7c1   :  { %838 = vperm.xlu1 %1676, %v836_v1  }
 0x812   :  { %v745_v60 = vpop.permute.xlu2 %744 }
 0x813   :  { %v747_v61 = vadd.f32 %v745_v60, %v2198_v26 }
 0x815   :  { %1731 = vtanh.f32 %v747_v61 }
 0x81b   :  { %v1732_v52 = vpop.eup %1731 }
 0x81c   :  { %751 = vrot.lane.b32.xlu2 %v1732_v52, %s1862_s29 }
 0x821   :  { %v761_v4 = vpop.permute.xlu0 %760 }
 0x822   :  { %v763_v48 = vadd.f32 %v761_v4, %v2213_v44  ;;  %v783_v53 = vadd.f32 %v761_v4, %v2092_v2 }
 0x823   :  { %v806_v37 = vpop.permute.xlu1 %805 }
 0x824   :  { %v1645_v6 = vmul.f32 -1.442695, %v763_v48  ;;  %v1646_v42 = vmul.f32 -1.442695, %v783_v53 }
 0x826   :  { %1733 = vpow2.f32 %v1645_v6 }
 0x82b   :  { %v2281_v50 = vpop.permute.xlu1 %827 }
 0x82c   :  { %v1734_v63 = vpop.eup %1733  ;;  %vm829_vm12 = vcmp.eq.s32.totalorder %v2281_v50, 1 }
 0x82d   :  { %v767_v7 = vadd.f32 1.0, %v1734_v63 }
 0x82f   :  { %1735 = vrcp.f32 %v767_v7  ;;  %v779_v30 = vand.u32 2147483648, %v767_v7  ;;  %v777_v17 = vand.u32 2147483647, %v767_v7  ;;  %vm773_vm8 = vweird.f32 %v767_v7 }
 0x831   :  { %v780_v35 = vor.u32 1.1754944e-38, %v779_v30  ;;  %vm778_vm11 = vcmp.eq.f32.partialorder %v777_v17, 8.507059e+37 }
 0x835   :  { %v1736_v62 = vpop.eup %1735 }
 0x836   :  { %v769_v33 = vmul.f32 %v1736_v62, %v767_v7  ;;  %vm774_vm6 = vweird.f32 %v1736_v62  ;;  %v2292_v7 = vpop.permute.xlu1 %838 }
 0x837   :  { %vm775_vm9 = vmor %vm773_vm8, %vm774_vm6  ;;  %vm840_vm6 = vcmp.eq.s32.totalorder %v2292_v7, 1 }
 0x838   :  { %v770_v10 = vsub.f32 1.0, %v769_v33 }
 0x83a   :  { %v771_v16 = vmul.f32 %v1736_v62, %v770_v10 }
 0x83c   :  { %v772_v22 = vadd.f32 %v1736_v62, %v771_v16 }
 0x83e   :  { %v776_v19 = vsel %vm775_vm9, %v1736_v62, %v772_v22 }
 0x83f   :  { %v781_v5 = vsel %vm778_vm11, %v780_v35, %v776_v19 }
 0x840   :  { %v808_v20 = vmul.f32 %v806_v37, %v781_v5 }
 0x842   :  { %810 = vrot.lane.b32.xlu0 %v808_v20, %s1859_s4 }
 0x876   :  { %v752_v40 = vpop.permute.xlu2 %751 }
 0x877   :  { %v754_v11 = vmul.f32 %v752_v40, %v749_v3 }
 0x879   :  { %v758_v41 = vadd.f32 %v757_v12, %v754_v11 }
 0x87b   :  { %v831_v13 = vrot.slane %v758_v41, 4 }
 0x87d   :  { %832 = vrot.lane.b32.xlu2 %v831_v13, %s1862_s29 }
 0x8b4   :  { %v811_v43 = vpop.permute.xlu0 %810 }
 0x8b5   :  { %v813_v14 = vadd.f32 %v811_v43, %v2092_v2 }
 0x8b7   :  { %1737 = vtanh.f32 %v813_v14 }
 0x8b8   :  { %1739 = vpow2.f32 %v1646_v42 }
 0x8bd   :  { %v1738_v45 = vpop.eup %1737 }
 0x8be   :  { %817 = vrot.lane.b32.xlu0 %v1738_v45, %s1862_s29  ;;  %v1740_v55 = vpop.eup %1739 }
 0x8bf   :  { %v787_v56 = vadd.f32 1.0, %v1740_v55 }
 0x8c1   :  { %1741 = vrcp.f32 %v787_v56  ;;  %v799_v52 = vand.u32 2147483648, %v787_v56  ;;  %vm793_vm2 = vweird.f32 %v787_v56  ;;  %v797_v48 = vand.u32 2147483647, %v787_v56 }
 0x8c3   :  { %v800_v6 = vor.u32 1.1754944e-38, %v799_v52  ;;  %vm798_vm5 = vcmp.eq.f32.partialorder %v797_v48, 8.507059e+37 }
 0x8c7   :  { %v1742_v57 = vpop.eup %1741 }
 0x8c8   :  { %v789_v0 = vmul.f32 %v1742_v57, %v787_v56  ;;  %vm794_vm15 = vweird.f32 %v1742_v57 }
 0x8c9   :  { %vm795_vm3 = vmor %vm793_vm2, %vm794_vm15 }
 0x8ca   :  { %v790_v1 = vsub.f32 1.0, %v789_v0 }
 0x8cc   :  { %v791_v60 = vmul.f32 %v1742_v57, %v790_v1 }
 0x8ce   :  { %v792_v61 = vadd.f32 %v1742_v57, %v791_v60 }
 0x8d7   :  { %v2284_v38 = vpop.permute.xlu2 %832 }
 0x8d8   :  { %v843_v51 = vsel %vm829_vm12, %v2284_v38, %v2231_v49  ;;  %v796_v49 = vsel %vm795_vm3, %v1742_v57, %v792_v61  ;;  %v835_v29 = vsel %vm829_vm12, %v2284_v38, 0.0 }
 0x8d9   :  { %1647 = vmatmul.msk.f32.vlgmr.msrb.gmra.mxu0 %vm52_vm0, %v843_v51  ;;  %v801_v63 = vsel %vm798_vm5, %v800_v6, %v796_v49 }
 0x8da   :  { %v815_v2 = vsub.f32 1.0, %v801_v63  ;;  %v821_v62 = vmul.f32 %v801_v63, %v2254_v34 }
 0x930   :  { %v818_v4 = vpop.permute.xlu0 %817 }
 0x931   :  { %v820_v33 = vmul.f32 %v818_v4, %v815_v2 }
 0x933   :  { %v2295_v10 = vadd.f32 %v821_v62, %v820_v33 }
 0x935   :  { %v2302_v30 = vsel %vm840_vm6, %v2295_v10, %v2254_v34 }
 0x936   :  { %1648 = vmatmul.msk.f32.vlgmr.msrb.gmra.mxu1 %vm52_vm0, %v2302_v30 }
 0x956   :  { %v865_v16 = vpop.f32.mrf.mxu0 }
 0x957   :  { %v911_v17 = vadd.f32 %v865_v16, %v2008_v15  ;;  %v891_v22 = vadd.f32 %v865_v16, %v2213_v44 }
 0x959   :  { %913 = vrot.lane.b32.xlu2 %v911_v17, %s1859_s4  ;;  %v1649_v35 = vmul.f32 -1.442695, %v891_v22 }
 0x95b   :  { %1743 = vpow2.f32 %v1649_v35 }
 0x961   :  { %v1744_v19 = vpop.eup %1743 }
 0x962   :  { %v895_v5 = vadd.f32 1.0, %v1744_v19 }
 0x964   :  { %1745 = vrcp.f32 %v895_v5  ;;  %v907_v40 = vand.u32 2147483648, %v895_v5  ;;  %vm901_vm9 = vweird.f32 %v895_v5  ;;  %v905_v11 = vand.u32 2147483647, %v895_v5 }
 0x966   :  { %v908_v41 = vor.u32 1.1754944e-38, %v907_v40  ;;  %vm906_vm15 = vcmp.eq.f32.partialorder %v905_v11, 8.507059e+37 }
 0x96a   :  { %v1746_v37 = vpop.eup %1745 }
 0x96b   :  { %v897_v20 = vmul.f32 %v1746_v37, %v895_v5  ;;  %vm902_vm8 = vweird.f32 %v1746_v37 }
 0x96c   :  { %vm903_vm11 = vmor %vm901_vm9, %vm902_vm8 }
 0x96d   :  { %v898_v39 = vsub.f32 1.0, %v897_v20 }
 0x96f   :  { %v899_v34 = vmul.f32 %v1746_v37, %v898_v39 }
 0x971   :  { %v900_v3 = vadd.f32 %v1746_v37, %v899_v34 }
 0x973   :  { %v904_v12 = vsel %vm903_vm11, %v1746_v37, %v900_v3 }
 0x974   :  { %v909_v14 = vsel %vm906_vm15, %v908_v41, %v904_v12 }
 0x975   :  { %v923_v37 = vsub.f32 1.0, %v909_v14 }
 0x9b3   :  { %v888_v13 = vpop.f32.mrf.mxu1  ;;  %v914_v43 = vpop.permute.xlu2 %913 }
 0x9b4   :  { %v935_v45 = vrot.slane %v888_v13, 4  ;;  %v979_v53 = vadd.f32 %v888_v13, %v2088_v59  ;;  %v916_v42 = vmul.f32 %v914_v43, %v909_v14 }
 0x9b6   :  { %v981_v55 = vrot.slane %v979_v53, 4  ;;  %936 = vrot.lane.b32.xlu1 %v935_v45, %s1862_s29  ;;  %918 = vrot.lane.b32.xlu0 %v916_v42, %s1859_s4 }
 0x9b8   :  { %982 = vrot.lane.b32.xlu2 %v981_v55, %s1863_s7 }
 0x9be   :  { %929 = vrot.lane.b32.xlu1 %v843_v51, %s1863_s7 }
 0xa12   :  { %v983_v17 = vpop.permute.xlu2 %982 }
 0xa28   :  { %v937_v56 = vpop.permute.xlu1 %936  ;;  %v919_v57 = vpop.permute.xlu0 %918 }
 0xa29   :  { %v939_v0 = vadd.f32 %v937_v56, %v2198_v26  ;;  %v921_v1 = vadd.f32 %v919_v57, %v2213_v44  ;;  %v959_v41 = vadd.f32 %v937_v56, %v2086_v58 }
 0xa2b   :  { %v1650_v60 = vmul.f32 -1.442695, %v939_v0  ;;  %1747 = vtanh.f32 %v921_v1  ;;  %v1651_v13 = vmul.f32 -1.442695, %v959_v41 }
 0xa2d   :  { %1749 = vpow2.f32 %v1650_v60 }
 0xa30   :  { %v930_v19 = vpop.permute.xlu1 %929 }
 0xa31   :  { %v1748_v61 = vpop.eup %1747  ;;  %v932_v34 = vmul.f32 %v930_v19, %v909_v14 }
 0xa32   :  { %925 = vrot.lane.b32.xlu0 %v1748_v61, %s1862_s29 }
 0xa33   :  { %v1750_v52 = vpop.eup %1749 }
 0xa34   :  { %v943_v48 = vadd.f32 1.0, %v1750_v52 }
 0xa36   :  { %1751 = vrcp.f32 %v943_v48  ;;  %v955_v2 = vand.u32 2147483648, %v943_v48  ;;  %v953_v4 = vand.u32 2147483647, %v943_v48  ;;  %vm949_vm3 = vweird.f32 %v943_v48 }
 0xa38   :  { %v956_v33 = vor.u32 1.1754944e-38, %v955_v2  ;;  %vm954_vm8 = vcmp.eq.f32.partialorder %v953_v4, 8.507059e+37 }
 0xa3c   :  { %v1752_v49 = vpop.eup %1751 }
 0xa3d   :  { %v945_v6 = vmul.f32 %v1752_v49, %v943_v48  ;;  %vm950_vm2 = vweird.f32 %v1752_v49  ;;  %v998_v48 = vrot.slane %v2302_v30, 4 }
 0xa3e   :  { %vm951_vm5 = vmor %vm949_vm3, %vm950_vm2 }
 0xa3f   :  { %v946_v63 = vsub.f32 1.0, %v945_v6 }
 0xa41   :  { %v947_v51 = vmul.f32 %v1752_v49, %v946_v63 }
 0xa43   :  { %v948_v62 = vadd.f32 %v1752_v49, %v947_v51 }
 0xa45   :  { %v952_v16 = vsel %vm951_vm5, %v1752_v49, %v948_v62 }
 0xa46   :  { %v957_v22 = vsel %vm954_vm8, %v956_v33, %v952_v16 }
 0xa47   :  { %v985_v35 = vmul.f32 %v983_v17, %v957_v22 }
 0xa49   :  { %987 = vrot.lane.b32.xlu2 %v985_v35, %s1859_s4 }
 0xaa3   :  { %v988_v5 = vpop.permute.xlu2 %987 }
 0xaa4   :  { %v990_v20 = vadd.f32 %v988_v5, %v2086_v58  ;;  %v926_v39 = vpop.permute.xlu0 %925 }
 0xaa5   :  { %v928_v3 = vmul.f32 %v926_v39, %v923_v37 }
 0xaa6   :  { %1753 = vtanh.f32 %v990_v20 }
 0xaa7   :  { %v2319_v40 = vadd.f32 %v932_v34, %v928_v3  ;;  %1755 = vpow2.f32 %v1651_v13 }
 0xaa9   :  { %v2324_v11 = vsel %vm840_vm6, %v2319_v40, %v930_v19 }
 0xaaa   :  { %1010 = vrot.lane.b32.xlu0 %v2324_v11, %s1862_s29 }
 0xaac   :  { %v1754_v12 = vpop.eup %1753 }
 0xaad   :  { %994 = vrot.lane.b32.xlu1 %v1754_v12, %s1862_s29  ;;  %v1756_v43 = vpop.eup %1755 }
 0xaae   :  { %v963_v14 = vadd.f32 1.0, %v1756_v43 }
 0xab0   :  { %1757 = vrcp.f32 %v963_v14  ;;  %v975_v0 = vand.u32 2147483648, %v963_v14  ;;  %vm969_vm11 = vweird.f32 %v963_v14  ;;  %v973_v1 = vand.u32 2147483647, %v963_v14 }
 0xab2   :  { %v976_v61 = vor.u32 1.1754944e-38, %v975_v0  ;;  %vm974_vm2 = vcmp.eq.f32.partialorder %v973_v1, 8.507059e+37 }
 0xab6   :  { %v1758_v45 = vpop.eup %1757 }
 0xab7   :  { %v965_v53 = vmul.f32 %v1758_v45, %v963_v14  ;;  %vm970_vm9 = vweird.f32 %v1758_v45 }
 0xab8   :  { %vm971_vm15 = vmor %vm969_vm11, %vm970_vm9 }
 0xab9   :  { %v966_v42 = vsub.f32 1.0, %v965_v53 }
 0xabb   :  { %v967_v55 = vmul.f32 %v1758_v45, %v966_v42 }
 0xabd   :  { %v968_v57 = vadd.f32 %v1758_v45, %v967_v55 }
 0xabf   :  { %v972_v60 = vsel %vm971_vm15, %v1758_v45, %v968_v57  ;;  %v1099_v45 = vrot.slane %v2324_v11, 4 }
 0xac0   :  { %v977_v52 = vsel %vm974_vm2, %v976_v61, %v972_v60 }
 0xac1   :  { %v992_v49 = vsub.f32 1.0, %v977_v52  ;;  %v1000_v63 = vmul.f32 %v998_v48, %v977_v52 }
 0xb1c   :  { %v2330_v56 = vpop.permute.xlu0 %1010 }
 0xb1d   :  { %1652 = vmatmul.msk.f32.vlgmr.msra.gmra.mxu2 %vm52_vm0, %v2330_v56 }
 0xb1f   :  { %v995_v6 = vpop.permute.xlu1 %994 }
 0xb20   :  { %v997_v2 = vmul.f32 %v995_v6, %v992_v49 }
 0xb22   :  { %v2335_v51 = vadd.f32 %v1000_v63, %v997_v2 }
 0xb24   :  { %v1004_v4 = vrot.slane %v2335_v51, 4 }
 0xb26   :  { %v2343_v62 = vsel %vm829_vm12, %v1004_v4, %v2302_v30  ;;  %v1006_v25 = vsel %vm829_vm12, %v1004_v4, 0.0 }
 0xb27   :  { %1653 = vmatmul.msk.f32.vlgmr.msra.gmra.mxu3 %vm52_vm0, %v2343_v62 }
 0xba0   :  { %v1031_v33 = vpop.f32.mrf.mxu2 }
 0xba1   :  { %v1058_v16 = vrot.slane %v1031_v33, 4  ;;  %v1080_v17 = vadd.f32 %v1031_v33, %v2008_v15 }
 0xba3   :  { %v1060_v22 = vadd.f32 %v1058_v16, %v2213_v44  ;;  %v1082_v35 = vrot.slane %v1080_v17, 4 }
 0xba5   :  { %v1654_v19 = vmul.f32 -1.442695, %v1060_v22  ;;  %1083 = vrot.lane.b32.xlu2 %v1082_v35, %s1859_s4 }
 0xba7   :  { %1759 = vpow2.f32 %v1654_v19 }
 0xbaa   :  { %v1054_v5 = vpop.f32.mrf.mxu3 }
 0xbab   :  { %v1147_v37 = vadd.f32 %v1054_v5, %v2088_v59  ;;  %1104 = vrot.lane.b32.xlu0 %v1054_v5, %s1862_s29 }
 0xbad   :  { %v1760_v30 = vpop.eup %1759  ;;  %1149 = vrot.lane.b32.xlu2 %v1147_v37, %s1863_s7 }
 0xbae   :  { %v1064_v20 = vadd.f32 1.0, %v1760_v30 }
 0xbb0   :  { %1761 = vrcp.f32 %v1064_v20  ;;  %v1076_v12 = vand.u32 2147483648, %v1064_v20  ;;  %v1074_v13 = vand.u32 2147483647, %v1064_v20  ;;  %vm1070_vm5 = vweird.f32 %v1064_v20 }
 0xbb2   :  { %v1077_v14 = vor.u32 1.1754944e-38, %v1076_v12  ;;  %vm1075_vm9 = vcmp.eq.f32.partialorder %v1074_v13, 8.507059e+37 }
 0xbb6   :  { %v1762_v39 = vpop.eup %1761 }
 0xbb7   :  { %v1066_v34 = vmul.f32 %v1762_v39, %v1064_v20  ;;  %vm1071_vm3 = vweird.f32 %v1762_v39 }
 0xbb8   :  { %vm1072_vm8 = vmor %vm1070_vm5, %vm1071_vm3 }
 0xbb9   :  { %v1067_v3 = vsub.f32 1.0, %v1066_v34 }
 0xbbb   :  { %v1068_v41 = vmul.f32 %v1762_v39, %v1067_v3 }
 0xbbd   :  { %v1069_v43 = vadd.f32 %v1762_v39, %v1068_v41 }
 0xbbf   :  { %v1073_v53 = vsel %vm1072_vm8, %v1762_v39, %v1069_v43 }
 0xbc0   :  { %v1078_v42 = vsel %vm1075_vm9, %v1077_v14, %v1073_v53 }
 0xbc1   :  { %v1101_v55 = vmul.f32 %v1099_v45, %v1078_v42  ;;  %v1093_v3 = vsub.f32 1.0, %v1078_v42 }
 0xbff   :  { %v1084_v57 = vpop.permute.xlu2 %1083 }
 0xc00   :  { %v1086_v0 = vmul.f32 %v1084_v57, %v1078_v42 }
 0xc02   :  { %1088 = vrot.lane.b32.xlu1 %v1086_v0, %s1859_s4 }
 0xc07   :  { %v1150_v35 = vpop.permute.xlu2 %1149 }
 0xc1d   :  { %v1105_v1 = vpop.permute.xlu0 %1104 }
 0xc1e   :  { %v1107_v60 = vadd.f32 %v1105_v1, %v2198_v26  ;;  %v1127_v14 = vadd.f32 %v1105_v1, %v2086_v58 }
 0xc20   :  { %v1655_v61 = vmul.f32 -1.442695, %v1107_v60 }
 0xc22   :  { %1763 = vpow2.f32 %v1655_v61 }
 0xc28   :  { %v1764_v52 = vpop.eup %1763 }
 0xc29   :  { %v1111_v48 = vadd.f32 1.0, %v1764_v52 }
 0xc2b   :  { %1765 = vrcp.f32 %v1111_v48  ;;  %v1123_v11 = vand.u32 2147483648, %v1111_v48  ;;  %v1121_v33 = vand.u32 2147483647, %v1111_v48  ;;  %vm1117_vm15 = vweird.f32 %v1111_v48 }
 0xc2d   :  { %v1124_v17 = vor.u32 1.1754944e-38, %v1123_v11  ;;  %vm1122_vm3 = vcmp.eq.f32.partialorder %v1121_v33, 8.507059e+37 }
 0xc31   :  { %v1766_v49 = vpop.eup %1765 }
 0xc32   :  { %v1113_v6 = vmul.f32 %v1766_v49, %v1111_v48  ;;  %vm1118_vm11 = vweird.f32 %v1766_v49 }
 0xc33   :  { %vm1119_vm2 = vmor %vm1117_vm15, %vm1118_vm11 }
 0xc34   :  { %v1114_v63 = vsub.f32 1.0, %v1113_v6 }
 0xc36   :  { %v1115_v2 = vmul.f32 %v1766_v49, %v1114_v63 }
 0xc38   :  { %v1116_v16 = vadd.f32 %v1766_v49, %v1115_v2 }
 0xc3a   :  { %v1120_v22 = vsel %vm1119_vm2, %v1766_v49, %v1116_v16 }
 0xc3b   :  { %v1125_v26 = vsel %vm1122_vm3, %v1124_v17, %v1120_v22 }
 0xc3c   :  { %v1152_v19 = vmul.f32 %v1150_v35, %v1125_v26 }
 0xc3e   :  { %1154 = vrot.lane.b32.xlu1 %v1152_v19, %s1859_s4 }
 0xc74   :  { %v1089_v5 = vpop.permute.xlu1 %1088 }
 0xc75   :  { %v1091_v37 = vadd.f32 %v1089_v5, %v2213_v44  ;;  %v1656_v44 = vmul.f32 -1.442695, %v1127_v14 }
 0xc77   :  { %1767 = vtanh.f32 %v1091_v37 }
 0xc7d   :  { %v1768_v30 = vpop.eup %1767 }
 0xc7e   :  { %1095 = vrot.lane.b32.xlu0 %v1768_v30, %s1862_s29 }
 0xcb0   :  { %v1155_v20 = vpop.permute.xlu1 %1154 }
 0xcb1   :  { %v1157_v39 = vadd.f32 %v1155_v20, %v2086_v58 }
 0xcb3   :  { %1769 = vtanh.f32 %v1157_v39 }
 0xcb4   :  { %1771 = vpow2.f32 %v1656_v44 }
 0xcb9   :  { %v1770_v34 = vpop.eup %1769 }
 0xcba   :  { %1161 = vrot.lane.b32.xlu0 %v1770_v34, %s1862_s29  ;;  %v1772_v45 = vpop.eup %1771 }
 0xcbb   :  { %v1131_v53 = vadd.f32 1.0, %v1772_v45 }
 0xcbd   :  { %1773 = vrcp.f32 %v1131_v53  ;;  %v1143_v42 = vand.u32 2147483648, %v1131_v53  ;;  %vm1137_vm8 = vweird.f32 %v1131_v53  ;;  %v1141_v48 = vand.u32 2147483647, %v1131_v53 }
 0xcbf   :  { %v1144_v49 = vor.u32 1.1754944e-38, %v1143_v42  ;;  %vm1142_vm11 = vcmp.eq.f32.partialorder %v1141_v48, 8.507059e+37 }
 0xcc3   :  { %v1774_v57 = vpop.eup %1773 }
 0xcc4   :  { %v1133_v0 = vmul.f32 %v1774_v57, %v1131_v53  ;;  %vm1138_vm5 = vweird.f32 %v1774_v57 }
 0xcc5   :  { %vm1139_vm9 = vmor %vm1137_vm8, %vm1138_vm5 }
 0xcc6   :  { %v1134_v60 = vsub.f32 1.0, %v1133_v0 }
 0xcc8   :  { %v1135_v61 = vmul.f32 %v1774_v57, %v1134_v60 }
 0xcca   :  { %v1136_v52 = vadd.f32 %v1774_v57, %v1135_v61 }
 0xcf0   :  { %v1096_v12 = vpop.permute.xlu0 %1095 }
 0xcf1   :  { %v1098_v41 = vmul.f32 %v1096_v12, %v1093_v3 }
 0xcf3   :  { %v1102_v13 = vadd.f32 %v1101_v55, %v1098_v41  ;;  %v1140_v55 = vsel %vm1139_vm9, %v1774_v57, %v1136_v52 }
 0xcf4   :  { %v1145_v58 = vsel %vm1142_vm11, %v1144_v49, %v1140_v55 }
 0xcf5   :  { %v1168_v43 = vrot.slane %v1102_v13, 4  ;;  %v1159_v1 = vsub.f32 1.0, %v1145_v58  ;;  %v1165_v63 = vmul.f32 %v1145_v58, %v2343_v62 }
 0xcf7   :  { %1169 = vrot.lane.b32.xlu2 %v1168_v43, %s1862_s29 }
 0xd2c   :  { %v1162_v6 = vpop.permute.xlu0 %1161 }
 0xd2d   :  { %v1164_v11 = vmul.f32 %v1162_v6, %v1159_v1 }
 0xd2f   :  { %v2364_v2 = vadd.f32 %v1165_v63, %v1164_v11 }
 0xd31   :  { %v2370_v33 = vsel %vm652_vm14, %v2364_v2, %v2343_v62 }
 0xd32   :  { %1658 = vmatmul.msk.f32.vlgmr.msra.gmra.mxu1 %vm52_vm0, %v2370_v33 }
 0xd51   :  { %v2374_v16 = vpop.permute.xlu2 %1169 }
 0xd52   :  { %v1175_v17 = vsel %vm658_vm10, %v2374_v16, %v2330_v56 }
 0xd53   :  { %1657 = vmatmul.msk.f32.vlgmr.msra.gmra.mxu0 %vm52_vm0, %v1175_v17 }
 0xdaf   :  { %v1220_v22 = vpop.f32.mrf.mxu1 }
 0xdb0   :  { %v1267_v35 = vrot.slane %v1220_v22, 4  ;;  %v1311_v19 = vadd.f32 %v1220_v22, %v2088_v59 }
 0xdb2   :  { %1268 = vrot.lane.b32.xlu2 %v1267_v35, %s1862_s29  ;;  %v1313_v5 = vrot.slane %v1311_v19, 4 }
 0xdd0   :  { %v1197_v26 = vpop.f32.mrf.mxu0 }
 0xdd1   :  { %v1243_v62 = vadd.f32 %v1197_v26, %v2008_v15  ;;  %v1223_v37 = vadd.f32 %v1197_v26, %v2100_v8 }
 0xdd3   :  { %1245 = vrot.lane.b32.xlu1 %v1243_v62, %s1859_s4  ;;  %v1659_v30 = vmul.f32 -1.442695, %v1223_v37 }
 0xdd5   :  { %1775 = vpow2.f32 %v1659_v30 }
 0xddb   :  { %1314 = vrot.lane.b32.xlu1 %v1313_v5, %s1863_s7  ;;  %v1776_v34 = vpop.eup %1775 }
 0xddc   :  { %v1227_v3 = vadd.f32 1.0, %v1776_v34 }
 0xdde   :  { %v1239_v60 = vand.u32 2147483648, %v1227_v3  ;;  %vm1233_vm2 = vweird.f32 %v1227_v3  ;;  %v1237_v61 = vand.u32 2147483647, %v1227_v3 }
 0xde0   :  { %v1240_v48 = vor.u32 1.1754944e-38, %v1239_v60  ;;  %vm1238_vm5 = vcmp.eq.f32.partialorder %v1237_v61, 8.507059e+37 }
 0xe0c   :  { %v1269_v56 = vpop.permute.xlu2 %1268 }
 0xe0d   :  { %v1271_v20 = vadd.f32 %v1269_v56, %v2025_v21  ;;  %v1291_v34 = vadd.f32 %v1269_v56, %v2083_v54 }
 0xe0f   :  { %v1660_v39 = vmul.f32 -1.442695, %v1271_v20 }
 0xe11   :  { %1777 = vpow2.f32 %v1660_v39 }
 0xe12   :  { %1779 = vrcp.f32 %v1227_v3 }
 0xe17   :  { %v1778_v12 = vpop.eup %1777 }
 0xe18   :  { %v1275_v41 = vadd.f32 1.0, %v1778_v12  ;;  %v1780_v13 = vpop.eup %1779 }
 0xe19   :  { %v1229_v43 = vmul.f32 %v1780_v13, %v1227_v3  ;;  %vm1234_vm15 = vweird.f32 %v1780_v13  ;;  %v1661_v3 = vmul.f32 -1.442695, %v1291_v34 }
 0xe1a   :  { %1781 = vrcp.f32 %v1275_v41  ;;  %vm1235_vm3 = vmor %vm1233_vm2, %vm1234_vm15  ;;  %v1287_v6 = vand.u32 2147483648, %v1275_v41  ;;  %vm1281_vm9 = vweird.f32 %v1275_v41  ;;  %v1285_v63 = vand.u32 2147483647, %v1275_v41 }
 0xe1b   :  { %v1230_v14 = vsub.f32 1.0, %v1229_v43 }
 0xe1c   :  { %v1288_v22 = vor.u32 1.1754944e-38, %v1287_v6  ;;  %vm1286_vm1 = vcmp.eq.f32.partialorder %v1285_v63, 8.507059e+37 }
 0xe1d   :  { %v1231_v45 = vmul.f32 %v1780_v13, %v1230_v14 }
 0xe1f   :  { %v1232_v57 = vadd.f32 %v1780_v13, %v1231_v45 }
 0xe20   :  { %v1782_v44 = vpop.eup %1781 }
 0xe21   :  { %v1277_v53 = vmul.f32 %v1782_v44, %v1275_v41  ;;  %v1236_v52 = vsel %vm1235_vm3, %v1780_v13, %v1232_v57  ;;  %vm1282_vm8 = vweird.f32 %v1782_v44 }
 0xe22   :  { %v1241_v49 = vsel %vm1238_vm5, %v1240_v48, %v1236_v52  ;;  %vm1283_vm11 = vmor %vm1281_vm9, %vm1282_vm8 }
 0xe23   :  { %v1278_v0 = vsub.f32 1.0, %v1277_v53  ;;  %v1255_v13 = vsub.f32 1.0, %v1241_v49 }
 0xe25   :  { %v1279_v42 = vmul.f32 %v1782_v44, %v1278_v0 }
 0xe27   :  { %v1280_v1 = vadd.f32 %v1782_v44, %v1279_v42 }
 0xe29   :  { %v1284_v11 = vsel %vm1283_vm11, %v1782_v44, %v1280_v1  ;;  %v1330_v1 = vrot.slane %v2370_v33, 4 }
 0xe2a   :  { %v1289_v26 = vsel %vm1286_vm1, %v1288_v22, %v1284_v11 }
 0xe45   :  { %v1246_v55 = vpop.permute.xlu1 %1245 }
 0xe46   :  { %v1248_v58 = vmul.f32 %v1246_v55, %v1241_v49 }
 0xe48   :  { %1250 = vrot.lane.b32.xlu0 %v1248_v58, %s1859_s4 }
 0xe4d   :  { %v1315_v35 = vpop.permute.xlu1 %1314 }
 0xe4e   :  { %v1317_v62 = vmul.f32 %v1315_v35, %v1289_v26  ;;  %v479_v26 = vsel %vm473_vm13, %v2161_v47, 0.0 }
 0xe50   :  { %1261 = vrot.lane.b32.xlu0 %v1175_v17, %s1863_s7  ;;  %1319 = vrot.lane.b32.xlu1 %v1317_v62, %s1859_s4 }
 0xeba   :  { %v1251_v19 = vpop.permute.xlu0 %1250 }
 0xebb   :  { %v1253_v5 = vadd.f32 %v1251_v19, %v2100_v8 }
 0xebd   :  { %1783 = vtanh.f32 %v1253_v5 }
 0xec2   :  { %v1320_v37 = vpop.permute.xlu1 %1319  ;;  %v1262_v41 = vpop.permute.xlu0 %1261 }
 0xec3   :  { %v1784_v30 = vpop.eup %1783  ;;  %v1322_v20 = vadd.f32 %v1320_v37, %v2083_v54  ;;  %v1264_v14 = vmul.f32 %v1262_v41, %v1241_v49 }
 0xec4   :  { %1257 = vrot.lane.b32.xlu2 %v1784_v30, %s1862_s29 }
 0xec5   :  { %1785 = vtanh.f32 %v1322_v20 }
 0xec6   :  { %1787 = vpow2.f32 %v1661_v3 }
 0xecb   :  { %v1786_v39 = vpop.eup %1785 }
 0xecc   :  { %1326 = vrot.lane.b32.xlu0 %v1786_v39, %s1862_s29  ;;  %v1788_v17 = vpop.eup %1787 }
 0xecd   :  { %v1295_v12 = vadd.f32 1.0, %v1788_v17 }
 0xecf   :  { %1789 = vrcp.f32 %v1295_v12  ;;  %v1307_v52 = vand.u32 2147483648, %v1295_v12  ;;  %vm1301_vm15 = vweird.f32 %v1295_v12  ;;  %v1305_v42 = vand.u32 2147483647, %v1295_v12 }
 0xed1   :  { %v1308_v55 = vor.u32 1.1754944e-38, %v1307_v52  ;;  %vm1306_vm3 = vcmp.eq.f32.partialorder %v1305_v42, 8.507059e+37 }
 0xed5   :  { %v1790_v57 = vpop.eup %1789 }
 0xed6   :  { %v1297_v56 = vmul.f32 %v1790_v57, %v1295_v12  ;;  %vm1302_vm1 = vweird.f32 %v1790_v57 }
 0xed7   :  { %vm1303_vm2 = vmor %vm1301_vm15, %vm1302_vm1 }
 0xed8   :  { %v1298_v0 = vsub.f32 1.0, %v1297_v56 }
 0xeda   :  { %v1299_v60 = vmul.f32 %v1790_v57, %v1298_v0 }
 0xedc   :  { %v1300_v61 = vadd.f32 %v1790_v57, %v1299_v60 }
 0xede   :  { %v1304_v48 = vsel %vm1303_vm2, %v1790_v57, %v1300_v61 }
 0xedf   :  { %v1309_v49 = vsel %vm1306_vm3, %v1308_v55, %v1304_v48 }
 0xee0   :  { %v1324_v58 = vsub.f32 1.0, %v1309_v49  ;;  %v1332_v63 = vmul.f32 %v1330_v1, %v1309_v49 }
 0xf1e   :  { %v1258_v43 = vpop.permute.xlu2 %1257 }
 0xf1f   :  { %v1260_v44 = vmul.f32 %v1258_v43, %v1255_v13 }
 0xf21   :  { %v2396_v45 = vadd.f32 %v1264_v14, %v1260_v44 }
 0xf23   :  { %v2401_v53 = vsel %vm484_vm4, %v2396_v45, %v1262_v41 }
 0xf24   :  { %1342 = vrot.lane.b32.xlu2 %v2401_v53, %s1862_s29 }
 0xf3e   :  { %v1327_v6 = vpop.permute.xlu0 %1326 }
 0xf3f   :  { %v1329_v11 = vmul.f32 %v1327_v6, %v1324_v58 }
 0xf41   :  { %v1333_v22 = vadd.f32 %v1332_v63, %v1329_v11 }
 0xf43   :  { %v1336_v35 = vrot.slane %v1333_v22, 4 }
 0xf45   :  { %v2412_v62 = vsel %vm473_vm13, %v1336_v35, %v2370_v33  ;;  %v1338_v19 = vsel %vm473_vm13, %v1336_v35, 0.0 }
 0xf46   :  { %1663 = vmatmul.msk.f32.vlgmr.msrb.gmra.mxu3 %vm52_vm0, %v2412_v62  ;;  %v2418_v5 = vadd.f32 %v1338_v19, %v479_v26 }
 0xf7e   :  { %v2420_v37 = vpop.permute.xlu2 %1342 }
 0xf7f   :  { %1662 = vmatmul.msk.f32.vlgmr.msrb.gmra.mxu2 %vm52_vm0, %v2420_v37 }
 0xfc9   :  { %v1386_v30 = vpop.f32.mrf.mxu3 }
 0xfca   :  { %1436 = vrot.lane.b32.xlu2 %v1386_v30, %s1862_s29  ;;  %v1479_v46 = vadd.f32 %v1386_v30, %v2088_v59 }
0x1002   :  { %v1363_v47 = vpop.f32.mrf.mxu2 }
0x1003   :  { %v1412_v33 = vadd.f32 %v1363_v47, %v2008_v15  ;;  %v1390_v39 = vrot.slane %v1363_v47, 4 }
0x1005   :  { %v1414_v20 = vrot.slane %v1412_v33, 4  ;;  %v1392_v34 = vadd.f32 %v1390_v39, %v2100_v8 }
0x1007   :  { %1415 = vrot.lane.b32.xlu1 %v1414_v20, %s1859_s4  ;;  %v1664_v3 = vmul.f32 -1.442695, %v1392_v34 }
0x1009   :  { %1791 = vpow2.f32 %v1664_v3  ;;  %v1173_v3 = vsel %vm652_vm14, %v2364_v2, 0.0 }
0x100f   :  { %1481 = vrot.lane.b32.xlu1 %v1479_v46, %s1863_s7  ;;  %v1792_v13 = vpop.eup %1791 }
0x1010   :  { %v1396_v43 = vadd.f32 1.0, %v1792_v13 }
0x1012   :  { %v1408_v42 = vand.u32 2147483648, %v1396_v43  ;;  %vm1402_vm13 = vweird.f32 %v1396_v43 }
0x1014   :  { %v1409_v49 = vor.u32 1.1754944e-38, %v1408_v42 }
0x1024   :  { %v1437_v17 = vpop.permute.xlu2 %1436 }
0x1025   :  { %v1439_v12 = vadd.f32 %v1437_v17, %v2025_v21  ;;  %v1406_v21 = vand.u32 2147483647, %v1396_v43 }
0x1027   :  { %v1665_v41 = vmul.f32 -1.442695, %v1439_v12  ;;  %vm1407_vm8 = vcmp.eq.f32.partialorder %v1406_v21, 8.507059e+37 }
0x1029   :  { %1793 = vpow2.f32 %v1665_v41  ;;  %v1459_v41 = vadd.f32 %v1437_v17, %v2083_v54 }
0x102a   :  { %1795 = vrcp.f32 %v1396_v43 }
0x102b   :  { %v1666_v13 = vmul.f32 -1.442695, %v1459_v41 }
0x102f   :  { %v1794_v15 = vpop.eup %1793 }
0x1030   :  { %v1443_v14 = vadd.f32 1.0, %v1794_v15  ;;  %v1796_v44 = vpop.eup %1795 }
0x1031   :  { %v1398_v59 = vmul.f32 %v1796_v44, %v1396_v43  ;;  %vm1403_vm0 = vweird.f32 %v1796_v44 }
0x1032   :  { %1797 = vrcp.f32 %v1443_v14  ;;  %vm1404_vm5 = vmor %vm1402_vm13, %vm1403_vm0  ;;  %v1455_v11 = vand.u32 2147483648, %v1443_v14  ;;  %vm1449_vm11 = vweird.f32 %v1443_v14  ;;  %v1453_v22 = vand.u32 2147483647, %v1443_v14 }
0x1033   :  { %v1399_v57 = vsub.f32 1.0, %v1398_v59 }
0x1034   :  { %v1456_v26 = vor.u32 1.1754944e-38, %v1455_v11  ;;  %vm1454_vm15 = vcmp.eq.f32.partialorder %v1453_v22, 8.507059e+37  ;;  %v1172_v11 = vsel %vm658_vm10, %v2374_v16, 0.0  ;;  %v841_v16 = vsel %vm840_vm6, %v2295_v10, 0.0 }
0x1035   :  { %v1400_v0 = vmul.f32 %v1796_v44, %v1399_v57 }
0x1037   :  { %v1401_v61 = vadd.f32 %v1796_v44, %v1400_v0 }
0x1038   :  { %v1798_v56 = vpop.eup %1797 }
0x1039   :  { %v1445_v60 = vmul.f32 %v1798_v56, %v1443_v14  ;;  %v1405_v48 = vsel %vm1404_vm5, %v1796_v44, %v1401_v61  ;;  %vm1450_vm9 = vweird.f32 %v1798_v56  ;;  %vm1573_vm5 = vcmask 257024  }
0x103a   :  { %v2431_v1 = vsel %vm1407_vm8, %v1409_v49, %v1405_v48  ;;  %vm1451_vm1 = vmor %vm1449_vm11, %vm1450_vm9  ;;  %v653_v49 = vsel %vm652_vm14, %v2218_v36, 0.0  ;;  %v662_v36 = vsel %vm658_vm10, %v660_v31, 0.0  ;;  %v1520_v31 = vadd.f32 %v1006_v25, %v835_v29 }
0x103b   :  { %v1446_v52 = vsub.f32 1.0, %v1445_v60  ;;  %v1425_v23 = vsub.f32 1.0, %v2431_v1 }
0x103d   :  { %v1447_v55 = vmul.f32 %v1798_v56, %v1446_v52 }
0x103f   :  { %v1448_v63 = vadd.f32 %v1798_v56, %v1447_v55 }
0x1041   :  { %v1452_v35 = vsel %vm1451_vm1, %v1798_v56, %v1448_v63 }
0x1042   :  { %v1457_v30 = vsel %vm1454_vm15, %v1456_v26, %v1452_v35  ;;  %v1526_v35 = vadd.f32 %v1172_v11, %v662_v36 }
0x1079   :  { %v1416_v58 = vpop.permute.xlu1 %1415 }
0x107a   :  { %v1418_v6 = vmul.f32 %v1416_v58, %v2431_v1 }
0x107c   :  { %1420 = vrot.lane.b32.xlu0 %v1418_v6, %s1859_s4  ;;  %v485_v6 = vsel %vm484_vm4, %v2180_v18, 0.0 }
0x1081   :  { %v1482_v19 = vpop.permute.xlu1 %1481 }
0x1082   :  { %v1484_v47 = vmul.f32 %v1482_v19, %v1457_v30  ;;  %v1002_v30 = vsel %vm840_vm6, %v2319_v40, 0.0 }
0x1084   :  { %1486 = vrot.lane.b32.xlu2 %v1484_v47, %s1859_s4 }
0x10de   :  { %v1487_v33 = vpop.permute.xlu2 %1486 }
0x10df   :  { %v1489_v20 = vadd.f32 %v1487_v33, %v2083_v54 }
0x10e1   :  { %1799 = vtanh.f32 %v1489_v20 }
0x10e7   :  { %v1800_v46 = vpop.eup %1799 }
0x10e8   :  { %1493 = vrot.lane.b32.xlu1 %v1800_v46, %s1862_s29 }
0x10ee   :  { %v1421_v39 = vpop.permute.xlu0 %1420 }
0x10ef   :  { %v1423_v34 = vadd.f32 %v1421_v39, %v2100_v8 }
0x10f0   :  { %1516 = vrot.lane.b32.xlu1 %v1173_v3, %s1863_s7 }
0x10f1   :  { %1801 = vtanh.f32 %v1423_v34 }
0x10f2   :  { %1803 = vpow2.f32 %v1666_v13 }
0x10f7   :  { %v1802_v12 = vpop.eup %1801 }
0x10f8   :  { %1427 = vrot.lane.b32.xlu0 %v1802_v12, %s1862_s29  ;;  %1534 = vrot.lane.b32.xlu1 %v2418_v5, %s1863_s7  ;;  %v1804_v43 = vpop.eup %1803 }
0x10f9   :  { %v1463_v15 = vadd.f32 1.0, %v1804_v43 }
0x10fb   :  { %1805 = vrcp.f32 %v1463_v15  ;;  %v1475_v57 = vand.u32 2147483648, %v1463_v15  ;;  %vm1469_vm3 = vweird.f32 %v1463_v15  ;;  %v1473_v56 = vand.u32 2147483647, %v1463_v15 }
0x10fd   :  { %v1476_v60 = vor.u32 1.1754944e-38, %v1475_v57  ;;  %vm1474_vm13 = vcmp.eq.f32.partialorder %v1473_v56, 8.507059e+37 }
0x1101   :  { %v1806_v8 = vpop.eup %1805 }
0x1102   :  { %v1465_v14 = vmul.f32 %v1806_v8, %v1463_v15  ;;  %vm1470_vm2 = vweird.f32 %v1806_v8 }
0x1103   :  { %vm1471_vm0 = vmor %vm1469_vm3, %vm1470_vm2 }
0x1104   :  { %v1466_v44 = vsub.f32 1.0, %v1465_v14 }
0x1106   :  { %v1467_v2 = vmul.f32 %v1806_v8, %v1466_v44 }
0x1108   :  { %v1468_v59 = vadd.f32 %v1806_v8, %v1467_v2 }
0x110a   :  { %v1472_v0 = vsel %vm1471_vm0, %v1806_v8, %v1468_v59 }
0x110b   :  { %v1477_v5 = vsel %vm1474_vm13, %v1476_v60, %v1472_v0 }
0x110c   :  { %v1491_v54 = vsub.f32 1.0, %v1477_v5  ;;  %v1497_v61 = vmul.f32 %v1477_v5, %v2412_v62 }
0x115a   :  { %v1494_v17 = vpop.permute.xlu1 %1493 }
0x115b   :  { %v1496_v52 = vmul.f32 %v1494_v17, %v1491_v54 }
0x115d   :  { %v1498_v42 = vadd.f32 %v1497_v61, %v1496_v52 }
0x115f   :  { %v1508_v21 = vsel %vm298_vm7, %v1498_v42, %v2412_v62  ;;  %v1505_v48 = vsel %vm298_vm7, %v1498_v42, 0.0  ;;  %v1431_v62 = vrot.slane %v2401_v53, 4  ;;  %vm2538_vm7 = vcmp.eq.s32.totalorder %v2128_v24, 1 }
0x1160   :  { %1584 = vst.msk [vmem:[#allocation4 + $0x4] sm:$0xf] %vm1573_vm5, %v1508_v21  ;;  %1510 = vrot.lane.b32.xlu0 %v1505_v48, %s1863_s7  ;;  %vm2539_vm14 = vmmov %vm2538_vm7 }
0x1161   :  { %v1433_v32 = vmul.f32 %v1431_v62, %v2431_v1 }
0x1162   :  { %v1517_v55 = vpop.permute.xlu1 %1516 }
0x1163   :  { %v1519_v58 = vadd.f32 %v1517_v55, %v653_v49 }
0x1168   :  { %1528 = vrot.lane.b32.xlu0 %v485_v6, %s1863_s7 }
0x116a   :  { %v1428_v63 = vpop.permute.xlu0 %1427  ;;  %v1535_v53 = vpop.permute.xlu1 %1534 }
0x116b   :  { %v1430_v22 = vmul.f32 %v1428_v63, %v1425_v23 }
0x116d   :  { %v1434_v18 = vadd.f32 %v1433_v32, %v1430_v22 }
0x116f   :  { %v1500_v26 = vrot.slane %v1434_v18, 4 }
0x1170   :  { %1540 = vrot.lane.b32.xlu0 %v1526_v35, %s1863_s7 }
0x1171   :  { %1501 = vrot.lane.b32.xlu2 %v1500_v26, %s1862_s29 }
0x1178   :  { %1551 = vrot.lane.b32.xlu0 %v1535_v53, %s1862_s29 }
0x1179   :  { %1522 = vrot.lane.b32.xlu2 %v841_v16, %s1863_s7 }
0x1181   :  { %1537 = vrot.lane.b32.xlu2 %v1520_v31, %s1863_s7 }
0x11cb   :  { %v1502_v1 = vpop.permute.xlu2 %1501 }
0x11cc   :  { %v1504_v19 = vsel %vm2538_vm7, %v1502_v1, 0.0  ;;  %v1507_v10 = vsel %vm2539_vm14, %v1502_v1, %v2420_v37 }
0x11cd   :  { %v1532_v51 = vadd.f32 %v1504_v19, %v2133_v27  ;;  %1582 = vst.msk [vmem:[#allocation4] sm:$0xf] %vm1573_vm5, %v1507_v10 }
0x11ce   :  { %1610 = dma.vmem_to_hbm [thread:$0]  %s1603_s10, 128, %s1605_s13, [#allocation5], %s1859_s4, %s1859_s4, %s1865_s14  }
0x11cf   :  { %1543 = vrot.lane.b32.xlu1 %v1532_v51, %s1863_s7 }
0x11d2   :  { %v1511_v4 = vpop.permute.xlu0 %1510 }
0x11d3   :  { %v1513_v50 = vadd.f32 %v1511_v4, %v2108_v28  ;;  %v1523_v38 = vpop.permute.xlu2 %1522  ;;  %v1334_v28 = vsel %vm484_vm4, %v2396_v45, 0.0 }
0x11d4   :  { %v1525_v47 = vadd.f32 %v1523_v38, %v1002_v30 }
0x11d5   :  { %1549 = vrot.lane.b32.xlu2 %v1513_v50, %s1862_s29 }
0x11d6   :  { %1557 = vrot.lane.b32.xlu0 %v1525_v47, %s1862_s29 }
0x11d7   :  { %1553 = vrot.lane.b32.xlu1 %v1519_v58, %s1862_s29 }
0x11da   :  { %v1529_v24 = vpop.permute.xlu0 %1528 }
0x11db   :  { %v1538_v27 = vpop.permute.xlu2 %1537  ;;  %v1531_v33 = vadd.f32 %v1529_v24, %v1334_v28 }
0x11dd   :  { %1555 = vrot.lane.b32.xlu2 %v1538_v27, %s1862_s29 }
0x11e2   :  { %v1541_v37 = vpop.permute.xlu0 %1540 }
0x11e3   :  { %1559 = vrot.lane.b32.xlu1 %v1541_v37, %s1862_s29 }
0x11e5   :  { %1561 = vrot.lane.b32.xlu2 %v1531_v33, %s1862_s29 }
0x11ea   :  { %v1552_v7 = vpop.permute.xlu0 %1551 }
0x11eb   :  { %1575 = vst.msk [vmem:[#allocation2 + $0x4] sm:$0xf] %vm1573_vm5, %v1552_v7 }
0x122f   :  { %v1550_v40 = vpop.permute.xlu2 %1549 }
0x1230   :  { %1574 = vst.msk [vmem:[#allocation2] sm:$0xf] %vm1573_vm5, %v1550_v40 }
0x1237   :  { %v1556_v20 = vpop.permute.xlu2 %1555 }
0x1238   :  { %1577 = vst.msk [vmem:[#allocation2 + $0xc] sm:$0xf] %vm1573_vm5, %v1556_v20 }
0x123f   :  { %v1562_v9 = vpop.permute.xlu2 %1561 }
0x1240   :  { %1580 = vst.msk [vmem:[#allocation2 + $0x18] sm:$0xf] %vm1573_vm5, %v1562_v9 }
0x1241   :  { %v1544_v45 = vpop.permute.xlu1 %1543 }
0x1242   :  { %1563 = vrot.lane.b32.xlu0 %v1544_v45, %s1862_s29 }
0x1248   :  { %v1558_v46 = vpop.permute.xlu0 %1557 }
0x1249   :  { %1578 = vst.msk [vmem:[#allocation2 + $0x10] sm:$0xf] %vm1573_vm5, %v1558_v46  ;;  %v1554_v39 = vpop.permute.xlu1 %1553 }
0x124a   :  { %1576 = vst.msk [vmem:[#allocation2 + $0x8] sm:$0xf] %vm1573_vm5, %v1554_v39 }
0x1255   :  { %v1560_v34 = vpop.permute.xlu1 %1559 }
0x1256   :  { %1579 = vst.msk [vmem:[#allocation2 + $0x14] sm:$0xf] %vm1573_vm5, %v1560_v34 }
0x12b4   :  { %v1564_v3 = vpop.permute.xlu0 %1563 }
0x12b5   :  { %1581 = vst.msk [vmem:[#allocation2 + $0x1c] sm:$0xf] %vm1573_vm5, %v1564_v3 }
0x12b6   :  { %1597 = dma.vmem_to_hbm [thread:$0]  %s1590_s5, 512, %s1592_s17, [#allocation3], %s1859_s4, %s1859_s4, %s1865_s14  }
0x12b7   :  { %1855 = dma.done.wait [#allocation3], 512  }
0x12b8   :  { %1856 = vsyncadd [#allocation3], 4294966784 }
0x12b9   :  { %1857 = dma.done.wait [#allocation5], 128  }
0x12ba   :  { %1858 = vsyncadd [#allocation5], 4294967168 }
0x12bb   :  { %1619 = vsyncpa [#allocation3], 1 }
0x12bc   :  { %1620 = vsyncpa [#allocation5], 1 }

</bundles_post_ra>
